<compile_context>
chip_gen: v6e
topology: v6e:2x2x1
jax: 0.10.0
libtpu: 0.0.40
codegen_flags: <defaults>
</compile_context>

<pallas_src>
import jax
import jax.numpy as jnp
from jax.experimental import pallas as pl
from jax.experimental.pallas import tpu as pltpu

LANE = 128
SUB = 16  # bf16 sublane pack -> keep batch tiles 16-aligned


def _round_up(x, m):
    return ((x + m - 1) // m) * m


def _transh_head_kernel(cls_ref, date_ref, norm_ref, wp_ref, bp_ref,
                        w1_ref, b1_ref, w2_ref, b2_ref, out_ref):
    # cls_ref:  (TB, 768)   bf16  CLS-token embeddings (stand-in encoder out)
    # date_ref: (TB, 1)     int32 time-bucket index per row
    # norm_ref: (T_pad, 768) bf16 pre-normalized time hyperplanes (pinned)
    # wp_ref:   (768, 768) bf16, bp_ref: (1, 768) f32   -- BERT pooler
    # w1_ref:   (768, 128) bf16, b1_ref: (1, 128) f32   -- linear_1 (lane-padded)
    # w2_ref:   (128, 128) bf16, b2_ref: (1, 128) f32   -- linear_2 (lane-padded)
    # out_ref:  (TB, 128) f32   lane-padded logits
    tb = cls_ref.shape[0]
    t_pad = norm_ref.shape[0]

    # --- BERT pooler: tanh(Linear(768,768)) on the CLS token ---------------
    pooled = jnp.tanh(
        jnp.dot(cls_ref[...], wp_ref[...], preferred_element_type=jnp.float32)
        + bp_ref[...]
    )

    # --- rebuild per-row hyperplane: one-hot(date) @ normalized table (MXU) -
    t_iota = jax.lax.broadcasted_iota(jnp.int32, (tb, t_pad), 1)
    onehot = (t_iota == date_ref[...]).astype(jnp.bfloat16)       # exact 0/1
    norm = jnp.dot(onehot, norm_ref[...], preferred_element_type=jnp.float32)

    # --- temporal_projection (TransH hyperplane projection), f32 -----------
    dot = jnp.sum(pooled * norm, axis=-1, keepdims=True)
    projected = pooled - dot * norm

    # --- classification head: tanh(linear_1) -> linear_2 -------------------
    h = jnp.tanh(
        jnp.dot(projected.astype(jnp.bfloat16), w1_ref[...],
                preferred_element_type=jnp.float32)
        + b1_ref[...]
    )
    logits = (
        jnp.dot(h.astype(jnp.bfloat16), w2_ref[...],
                preferred_element_type=jnp.float32)
        + b2_ref[...]
    )
    out_ref[...] = logits.astype(out_ref.dtype)


def transh_head(cls_embeds, date, time_emb, wp, bp, w1, b1, w2, b2, *,
                block_b=512):
    """Fused pooler + temporal projection + classification head."""
    B, H = cls_embeds.shape
    T = time_emb.shape[0]
    mid, C = w2.shape
    mid_pad = _round_up(mid, LANE)
    c_pad = _round_up(C, LANE)
    t_pad = _round_up(max(T, 1), LANE)   # lane-aligned one-hot, same MXU passes

    # Pre-normalize the tiny time table once (F.normalize p=2, eps=1e-12),
    # zero-pad rows (never selected: date < T) and cast to bf16 for the MXU.
    t32 = time_emb.astype(jnp.float32)
    t_norm = jnp.sqrt(jnp.sum(t32 * t32, axis=-1, keepdims=True))
    norm_tbl = t32 / jnp.maximum(t_norm, 1e-12)
    norm_tbl = jnp.pad(norm_tbl, ((0, t_pad - T), (0, 0))).astype(jnp.bfloat16)

    # Lane-pad narrow head weights (zero pad -> padded outputs are exactly 0)
    # and cast matmul weights to bf16; biases stay f32 (added post-accumulate).
    wp_b = wp.astype(jnp.bfloat16)
    bp_f = bp.astype(jnp.float32)
    w1_b = jnp.pad(w1, ((0, 0), (0, mid_pad - mid))).astype(jnp.bfloat16)
    b1_f = jnp.pad(b1, ((0, 0), (0, mid_pad - mid))).astype(jnp.float32)
    w2_b = jnp.pad(w2, ((0, mid_pad - mid), (0, c_pad - C))).astype(jnp.bfloat16)
    b2_f = jnp.pad(b2, ((0, 0), (0, c_pad - C))).astype(jnp.float32)

    # Batch tiling: 16-aligned tiles, and always >= 2 grid steps so the
    # "parallel" batch axis can feed both TensorCores on v7x.
    block_b = _round_up(block_b, SUB)
    tb = max(SUB, min(block_b, _round_up(pl.cdiv(B, 2), SUB)))
    b_pad = _round_up(B, tb)
    if b_pad // tb < 2:
        b_pad = 2 * tb

    cls_embeds = cls_embeds.astype(jnp.bfloat16)          # bf16 stream
    date_col = date.astype(jnp.int32).reshape(B, 1)        # 4 bytes / row
    if b_pad != B:
        pad = b_pad - B
        cls_embeds = jnp.pad(cls_embeds, ((0, pad), (0, 0)))
        date_col = jnp.pad(date_col, ((0, pad), (0, 0)))

    grid_spec = pltpu.PrefetchScalarGridSpec(
        num_scalar_prefetch=0,
        grid=(b_pad // tb,),
        in_specs=[
            # activations: new tile per batch step (double-buffered by Pallas)
            pl.BlockSpec((tb, H), lambda i: (i, 0)),
            pl.BlockSpec((tb, 1), lambda i: (i, 0)),
            # tables / weights / biases: pinned to block (0, 0) -> VMEM-resident
            pl.BlockSpec((t_pad, H), lambda i: (0, 0)),
            pl.BlockSpec((H, H), lambda i: (0, 0)),
            pl.BlockSpec((1, H), lambda i: (0, 0)),
            pl.BlockSpec((H, mid_pad), lambda i: (0, 0)),
            pl.BlockSpec((1, mid_pad), lambda i: (0, 0)),
            pl.BlockSpec((mid_pad, c_pad), lambda i: (0, 0)),
            pl.BlockSpec((1, c_pad), lambda i: (0, 0)),
        ],
        out_specs=pl.BlockSpec((tb, c_pad), lambda i: (i, 0)),
    )

    out = pl.pallas_call(
        _transh_head_kernel,
        out_shape=jax.ShapeDtypeStruct((b_pad, c_pad), jnp.float32),
        grid_spec=grid_spec,
        compiler_params=pltpu.CompilerParams(
            dimension_semantics=("parallel",),
            vmem_limit_bytes=64 << 20,   # kernel needs ~6 MiB at TB=512
        ),
    )(cls_embeds, date_col, norm_tbl, wp_b, bp_f, w1_b, b1_f, w2_b, b2_f)

    # Strip batch and lane padding.
    return out[:B, :C]


def transh_forward(params, input_ids, date):
    """Full forward (glue + Pallas kernel). Returns logits (B, num_labels)."""
    # CLS-token embedding lookup; table cast to bf16 first so the gather writes
    # and the kernel reads half the bytes (the kernel fed the MXU bf16 anyway).
    word_emb_b = params["word_emb"].astype(jnp.bfloat16)
    cls_embeds = jnp.take(word_emb_b, input_ids[:, 0], axis=0)   # (B, 768) bf16
    return transh_head(
        cls_embeds, date, params["time_emb"],
        params["wp"], params["bp"],
        params["w1"], params["b1"],
        params["w2"], params["b2"],
    )


def _reference_forward(params, input_ids, date):
    """Pure-JAX reference (same bf16-operand / f32-accumulate matmul recipe,
    but with the time-hyperplane normalize kept fully in f32)."""
    bf16, f32 = jnp.bfloat16, jnp.float32
    cls = jnp.take(params["word_emb"], input_ids[:, 0], axis=0)
    time_embeds = jnp.take(params["time_emb"], date, axis=0)
    pooled = jnp.tanh(
        jnp.dot(cls.astype(bf16), params["wp"].astype(bf16),
                preferred_element_type=f32) + params["bp"]
    )
    t = time_embeds
    norm = t / jnp.maximum(jnp.sqrt(jnp.sum(t * t, -1, keepdims=True)), 1e-12)
    proj = pooled - jnp.sum(pooled * norm, -1, keepdims=True) * norm
    h = jnp.tanh(
        jnp.dot(proj.astype(bf16), params["w1"].astype(bf16),
                preferred_element_type=f32) + params["b1"]
    )
    return (jnp.dot(h.astype(bf16), params["w2"].astype(bf16),
                    preferred_element_type=f32) + params["b2"])


if __name__ == "__main__":
    # Small, module-consistent shapes.
    B = 8                 # batch
    S = 8                 # sequence length
    VOCAB = 32            # toy vocab for the word embedding table
    HIDDEN = 768          # fixed by the module (linear_1: 768 -> 100)
    MID = 100
    NUM_LABELS = 3        # nr_classes
    NUM_TIME = 5          # num_time_classes

    key = jax.random.PRNGKey(0)
    ks = jax.random.split(key, 10)
    scale = 0.02
    params = {
        "word_emb": scale * jax.random.normal(ks[0], (VOCAB, HIDDEN), jnp.float32),
        "time_emb": scale * jax.random.normal(ks[1], (NUM_TIME, HIDDEN), jnp.float32),
        "wp": scale * jax.random.normal(ks[2], (HIDDEN, HIDDEN), jnp.float32),
        "bp": scale * jax.random.normal(ks[3], (1, HIDDEN), jnp.float32),
        "w1": scale * jax.random.normal(ks[4], (HIDDEN, MID), jnp.float32),
        "b1": scale * jax.random.normal(ks[5], (1, MID), jnp.float32),
        "w2": scale * jax.random.normal(ks[6], (MID, NUM_LABELS), jnp.float32),
        "b2": scale * jax.random.normal(ks[7], (1, NUM_LABELS), jnp.float32),
    }

    input_ids = jax.random.randint(ks[8], (B, S), 0, VOCAB, dtype=jnp.int32)
    date = jax.random.randint(ks[9], (B,), 0, NUM_TIME, dtype=jnp.int32)

    logits = jax.block_until_ready(transh_forward(params, input_ids, date))
    ref = jax.block_until_ready(_reference_forward(params, input_ids, date))

    assert logits.shape == (B, NUM_LABELS), logits.shape
    assert jnp.allclose(logits, ref, atol=2e-3, rtol=2e-3), (
        f"max abs diff {jnp.max(jnp.abs(logits - ref))}"
    )
    print("KERNEL_OK")
</pallas_src>

<mosaic_0001>
module attributes {stable_mosaic.version = 11 : i64} {
  func.func @_transh_head_kernel(%arg0: i32, %arg1: memref<16x768xbf16, #tpu.memory_space<vmem>>, %arg2: memref<16x1xi32, #tpu.memory_space<vmem>>, %arg3: memref<128x768xbf16, #tpu.memory_space<vmem>>, %arg4: memref<768x768xbf16, #tpu.memory_space<vmem>>, %arg5: memref<1x768xf32, #tpu.memory_space<vmem>>, %arg6: memref<768x128xbf16, #tpu.memory_space<vmem>>, %arg7: memref<1x128xf32, #tpu.memory_space<vmem>>, %arg8: memref<128x128xbf16, #tpu.memory_space<vmem>>, %arg9: memref<1x128xf32, #tpu.memory_space<vmem>>, %arg10: memref<16x128xf32, #tpu.memory_space<vmem>>) attributes {dimension_semantics = [#tpu.dimension_semantics<parallel>], iteration_bounds = array<i64: 2>, scalar_prefetch = 0 : i64, scratch_operands = 0 : i64, tpu.core_type = #tpu.core_type<tc>, window_params = [{transform_indices = @transform_0, window_bounds = array<i64: 16, 768>}, {transform_indices = @transform_1, window_bounds = array<i64: 16, 1>}, {pipeline_mode = #tpu.pipeline_mode<synchronous>, transform_indices = @transform_2, window_bounds = array<i64: 128, 768>}, {pipeline_mode = #tpu.pipeline_mode<synchronous>, transform_indices = @transform_3, window_bounds = array<i64: 768, 768>}, {pipeline_mode = #tpu.pipeline_mode<synchronous>, transform_indices = @transform_4, window_bounds = array<i64: 1, 768>}, {pipeline_mode = #tpu.pipeline_mode<synchronous>, transform_indices = @transform_5, window_bounds = array<i64: 768, 128>}, {pipeline_mode = #tpu.pipeline_mode<synchronous>, transform_indices = @transform_6, window_bounds = array<i64: 1, 128>}, {pipeline_mode = #tpu.pipeline_mode<synchronous>, transform_indices = @transform_7, window_bounds = array<i64: 128, 128>}, {pipeline_mode = #tpu.pipeline_mode<synchronous>, transform_indices = @transform_8, window_bounds = array<i64: 1, 128>}, {transform_indices = @transform_9, window_bounds = array<i64: 16, 128>}]} {
    %c0 = arith.constant 0 : index
    %c0_0 = arith.constant 0 : index
    %0 = vector.load %arg1[%c0, %c0_0] : memref<16x768xbf16, #tpu.memory_space<vmem>>, vector<16x768xbf16>
    %c0_1 = arith.constant 0 : index
    %c0_2 = arith.constant 0 : index
    %1 = vector.load %arg4[%c0_1, %c0_2] : memref<768x768xbf16, #tpu.memory_space<vmem>>, vector<768x768xbf16>
    %cst = arith.constant dense<0.000000e+00> : vector<16x768xf32>
    %2 = tpu.matmul %0, %1, %cst {dimension_numbers = #tpu.dot_dimension_numbers<[1], [0], [0], [1], [0, 0, 1, 1], [], []>} : vector<16x768xbf16>, vector<768x768xbf16>, vector<16x768xf32> -> vector<16x768xf32>
    %c0_3 = arith.constant 0 : index
    %c0_4 = arith.constant 0 : index
    %3 = vector.load %arg5[%c0_3, %c0_4] : memref<1x768xf32, #tpu.memory_space<vmem>>, vector<1x768xf32>
    %4 = vector.broadcast %3 : vector<1x768xf32> to vector<16x768xf32>
    %5 = arith.addf %2, %4 : vector<16x768xf32>
    %6 = math.tanh %5 : vector<16x768xf32>
    %7 = tpu.iota {dimensions = array<i32: 1>} : vector<16x128xi32>
    %c0_5 = arith.constant 0 : index
    %c0_6 = arith.constant 0 : index
    %8 = vector.load %arg2[%c0_5, %c0_6] : memref<16x1xi32, #tpu.memory_space<vmem>>, vector<16x1xi32>
    %9 = vector.broadcast %8 : vector<16x1xi32> to vector<16x128xi32>
    %10 = arith.cmpi eq, %7, %9 : vector<16x128xi32>
    %11 = arith.extui %10 : vector<16x128xi1> to vector<16x128xi32>
    %12 = arith.sitofp %11 : vector<16x128xi32> to vector<16x128xf32>
    %13 = arith.truncf %12 : vector<16x128xf32> to vector<16x128xbf16>
    %c0_7 = arith.constant 0 : index
    %c0_8 = arith.constant 0 : index
    %14 = vector.load %arg3[%c0_7, %c0_8] : memref<128x768xbf16, #tpu.memory_space<vmem>>, vector<128x768xbf16>
    %cst_9 = arith.constant dense<0.000000e+00> : vector<16x768xf32>
    %15 = tpu.matmul %13, %14, %cst_9 {dimension_numbers = #tpu.dot_dimension_numbers<[1], [0], [0], [1], [0, 0, 1, 1], [], []>} : vector<16x128xbf16>, vector<128x768xbf16>, vector<16x768xf32> -> vector<16x768xf32>
    %16 = arith.mulf %6, %15 : vector<16x768xf32>
    %cst_10 = arith.constant dense<0.000000e+00> : vector<16xf32>
    %17 = vector.multi_reduction <add>, %16, %cst_10 [1] : vector<16x768xf32> to vector<16xf32>
    %18 = vector.shape_cast %17 : vector<16xf32> to vector<16x1xf32>
    %19 = vector.broadcast %18 : vector<16x1xf32> to vector<16x768xf32>
    %20 = arith.mulf %19, %15 : vector<16x768xf32>
    %21 = arith.subf %6, %20 : vector<16x768xf32>
    %22 = arith.truncf %21 : vector<16x768xf32> to vector<16x768xbf16>
    %c0_11 = arith.constant 0 : index
    %c0_12 = arith.constant 0 : index
    %23 = vector.load %arg6[%c0_11, %c0_12] : memref<768x128xbf16, #tpu.memory_space<vmem>>, vector<768x128xbf16>
    %cst_13 = arith.constant dense<0.000000e+00> : vector<16x128xf32>
    %24 = tpu.matmul %22, %23, %cst_13 {dimension_numbers = #tpu.dot_dimension_numbers<[1], [0], [0], [1], [0, 0, 1, 1], [], []>} : vector<16x768xbf16>, vector<768x128xbf16>, vector<16x128xf32> -> vector<16x128xf32>
    %c0_14 = arith.constant 0 : index
    %c0_15 = arith.constant 0 : index
    %25 = vector.load %arg7[%c0_14, %c0_15] : memref<1x128xf32, #tpu.memory_space<vmem>>, vector<1x128xf32>
    %26 = vector.broadcast %25 : vector<1x128xf32> to vector<16x128xf32>
    %27 = arith.addf %24, %26 : vector<16x128xf32>
    %28 = math.tanh %27 : vector<16x128xf32>
    %29 = arith.truncf %28 : vector<16x128xf32> to vector<16x128xbf16>
    %c0_16 = arith.constant 0 : index
    %c0_17 = arith.constant 0 : index
    %30 = vector.load %arg8[%c0_16, %c0_17] : memref<128x128xbf16, #tpu.memory_space<vmem>>, vector<128x128xbf16>
    %cst_18 = arith.constant dense<0.000000e+00> : vector<16x128xf32>
    %31 = tpu.matmul %29, %30, %cst_18 {dimension_numbers = #tpu.dot_dimension_numbers<[1], [0], [0], [1], [0, 0, 1, 1], [], []>} : vector<16x128xbf16>, vector<128x128xbf16>, vector<16x128xf32> -> vector<16x128xf32>
    %c0_19 = arith.constant 0 : index
    %c0_20 = arith.constant 0 : index
    %32 = vector.load %arg9[%c0_19, %c0_20] : memref<1x128xf32, #tpu.memory_space<vmem>>, vector<1x128xf32>
    %33 = vector.broadcast %32 : vector<1x128xf32> to vector<16x128xf32>
    %34 = arith.addf %31, %33 : vector<16x128xf32>
    %c0_21 = arith.constant 0 : index
    %c0_22 = arith.constant 0 : index
    %35 = vector.load %arg10[%c0_21, %c0_22] : memref<16x128xf32, #tpu.memory_space<vmem>>, vector<16x128xf32>
    tpu.vector_store %arg10[%c0_21, %c0_22], %34 {strides = array<i32>} : memref<16x128xf32, #tpu.memory_space<vmem>>, vector<16x128xf32>,
    return
  }
  func.func @transform_0(%arg0: i32) -> (i32, i32) {
    %c0_i32 = arith.constant 0 : i32
    %c0_i32_0 = arith.constant 0 : i32
    return %arg0, %c0_i32 : i32, i32
  }
  func.func @transform_1(%arg0: i32) -> (i32, i32) {
    %c0_i32 = arith.constant 0 : i32
    %c0_i32_0 = arith.constant 0 : i32
    return %arg0, %c0_i32 : i32, i32
  }
  func.func @transform_2(%arg0: i32) -> (i32, i32) {
    %c0_i32 = arith.constant 0 : i32
    %c0_i32_0 = arith.constant 0 : i32
    %c0_i32_1 = arith.constant 0 : i32
    return %c0_i32, %c0_i32_0 : i32, i32
  }
  func.func @transform_3(%arg0: i32) -> (i32, i32) {
    %c0_i32 = arith.constant 0 : i32
    %c0_i32_0 = arith.constant 0 : i32
    %c0_i32_1 = arith.constant 0 : i32
    return %c0_i32, %c0_i32_0 : i32, i32
  }
  func.func @transform_4(%arg0: i32) -> (i32, i32) {
    %c0_i32 = arith.constant 0 : i32
    %c0_i32_0 = arith.constant 0 : i32
    %c0_i32_1 = arith.constant 0 : i32
    return %c0_i32, %c0_i32_0 : i32, i32
  }
  func.func @transform_5(%arg0: i32) -> (i32, i32) {
    %c0_i32 = arith.constant 0 : i32
    %c0_i32_0 = arith.constant 0 : i32
    %c0_i32_1 = arith.constant 0 : i32
    return %c0_i32, %c0_i32_0 : i32, i32
  }
  func.func @transform_6(%arg0: i32) -> (i32, i32) {
    %c0_i32 = arith.constant 0 : i32
    %c0_i32_0 = arith.constant 0 : i32
    %c0_i32_1 = arith.constant 0 : i32
    return %c0_i32, %c0_i32_0 : i32, i32
  }
  func.func @transform_7(%arg0: i32) -> (i32, i32) {
    %c0_i32 = arith.constant 0 : i32
    %c0_i32_0 = arith.constant 0 : i32
    %c0_i32_1 = arith.constant 0 : i32
    return %c0_i32, %c0_i32_0 : i32, i32
  }
  func.func @transform_8(%arg0: i32) -> (i32, i32) {
    %c0_i32 = arith.constant 0 : i32
    %c0_i32_0 = arith.constant 0 : i32
    %c0_i32_1 = arith.constant 0 : i32
    return %c0_i32, %c0_i32_0 : i32, i32
  }
  func.func @transform_9(%arg0: i32) -> (i32, i32) {
    %c0_i32 = arith.constant 0 : i32
    %c0_i32_0 = arith.constant 0 : i32
    return %arg0, %c0_i32 : i32, i32
  }
}

</mosaic_0001>

<bundles_post_ra>
// kernel: tpu_custom_call.1
= control target key start
LH: loop header
LB: loop body
LE: loop exit
PB: predicated region body
PF: predicated region fallthrough
CT: control target
= control target key end

     0   :  { %s5969_s0 = inlined_call_operand.hbm [shape: bf16[32,768], index: 0, kind: input, shape index: {}]   ;;  %s5970_s1 = inlined_call_operand.vmem [shape: s32[32,1], index: 1, kind: input, shape index: {}]   ;;  %s5971_s2 = inlined_call_operand.hbm [shape: bf16[128,768], index: 2, kind: input, shape index: {}]   ;;  %s5972_s3 = inlined_call_operand.hbm [shape: bf16[768,768], index: 3, kind: input, shape index: {}]   ;;  %s5973_s4 = inlined_call_operand.hbm [shape: f32[1,768], index: 4, kind: input, shape index: {}]   ;;  %s5974_s5 = inlined_call_operand.hbm [shape: bf16[768,128], index: 5, kind: input, shape index: {}]   ;;  %s5975_s6 = inlined_call_operand.hbm [shape: f32[1,128], index: 6, kind: input, shape index: {}]   ;;  %s5976_s7 = inlined_call_operand.hbm [shape: bf16[128,128], index: 7, kind: input, shape index: {}]   ;;  %s5977_s8 = inlined_call_operand.hbm [shape: f32[1,128], index: 8, kind: input, shape index: {}]   ;;  %s5978_s9 = inlined_call_operand.hbm [shape: f32[32,128], index: 9, kind: output, shape index: {}]  }
   0x1   :  { %5985 = sst [smem:[#allocation23_spill]] %s5971_s2 }
   0x2   :  { %5986 = sst [smem:[#allocation24_spill]] %s5972_s3 }
   0x3   :  { %5987 = sst [smem:[#allocation25_spill]] %s5973_s4 }
   0x4   :  { %14 = vsyncpa [#allocation3], 0 }
   0x5   :  { %16 = vsyncpa [#allocation3 + $0x1], 0 }
   0x6   :  { %17 = vsyncpa [#allocation6], 0 }
   0x7   :  { %18 = vsyncpa [#allocation9], 0 }
   0x8   :  { %19 = vsyncpa [#allocation12], 0 }
   0x9   :  { %20 = vsyncpa [#allocation15], 0 }
   0xa   :  { %21 = vsyncpa [#allocation4], 0 }
   0xb   :  { %23 = vsyncpa [#allocation4 + $0x1], 0  ;;  %s5583_s30 = smov 0   ;;  %s5585_s10 = smov 0  }
   0xc   :  { %s5587_s11 = smov 0   ;;  %s5589_s12 = smov 0  }
   0xd LB: > { %s5514_s13 = smov [#allocation5]   ;;  %s5604_s15 = sadd.s32 4294967295, %s5512_s12   ;;  %s5512_s12 = sphi %s5589_s12, %s6019_s12   ;;  %s5508_s11 = sphi %s5587_s11, %s6018_s11   ;;  %s5504_s10 = sphi %s5585_s10, %s6017_s10   ;;  %s5500_s30 = sphi %s5583_s30, %s6016_s30  }
   0xe   : > { %s271_s14 = sshll.u32 %s5514_s13, 4  ;;  %p3956_p0 = scmp.ge.s32.totalorder %s5512_s12, 1  ;;  %s272_s14 = int_to_ptr.vmem [resolvable:$true] %s271_s14 }
   0xf   : > { %p5979_p1 = scmp.eq.s32.totalorder %s5604_s15, 0  ;;  %p259_p2 = scmp.lt.s32.totalorder %s5512_s12, 3 }
  0x10   : > { %s5515_s17 = smov [#allocation8]   ;;  %s5516_s20 = smov [#allocation11]  }
  0x11   : > { %p5609_p3 = pnand %p3956_p0, %p259_p2  ;;  %s298_s18 = sshll.u32 %s5515_s17, 4  ;;  %s299_s18 = int_to_ptr.vmem [resolvable:$true] %s298_s18 }
  0x12   : > { %s322_s21 = sshll.u32 %s5516_s20, 4  ;;  %s5233_s23 = scalar_lea.vmem %s272_s14, 6144  ;;  %s5622_s21 = int_to_ptr.vmem [resolvable:$true] %s322_s21 }
  0x13   : > { %s5988_s16 = scalar_select %p5609_p3, 1, 0 }
  0x14   : > { %p4523_p5 = pneg %p5609_p3  ;;  %p5234_p8 = scmp.ne.s32.totalorder %s272_s14, %s5233_s23 }
  0x15   : > { %p5241_p11 = scmp.lt.s32.totalorder %s272_s14, %s272_s14  ;;  %p5242_p12 = scmp.lt.s32.totalorder %s5233_s23, %s5233_s23 }
  0x16   : > { %p5618_p6 = pnand %p4523_p5, %p5979_p1 }
  0x17   : > { %p5243_p13 = por %p5242_p12, %p5241_p11 }
  0x18   : > { %p5626_p7 = pneg %p5618_p6 }
  0x1a   : > { %p5236_p9 = pnand %p5234_p8, %p5626_p7 }
  0x1c   : > { %p5237_p10 = pneg %p5236_p9 }
  0x1e   : > { %p5244_p0 = pnand %p5243_p13, %p5237_p10 }
  0x20   : > { %5247 = shalt.err (!%p5244_p0)
}
  0x21   : > { %s5980_s24 = smov 384   ;;  %s5981_s25 = smov 24  }
  0x22   : > { %s5991_s2 = sld [smem:[#allocation23_spill]]  ;;  %s5259_s28 = scalar_lea.vmem %s299_s18, 96 }
  0x23   : > { %p5260_p2 = scmp.ne.s32.totalorder %s299_s18, %s5259_s28  ;;  %p5267_p9 = scmp.lt.s32.totalorder %s299_s18, %s299_s18 }
  0x24   : > { %p5268_p10 = scmp.lt.s32.totalorder %s5259_s28, %s5259_s28 }
  0x25   : > { %p5262_p5 = pnand %p5260_p2, %p5626_p7 }
  0x26   : > { %p5269_p11 = por %p5268_p10, %p5267_p9 }
  0x27   : > { %p5263_p8 = pneg %p5262_p5 }
  0x28   : > { %4526 = dma.hbm_to_vmem [thread:$0]  (!%p5618_p6), %s5991_s2, 6144, %s272_s14, [#allocation6], %s5980_s24, %s5980_s24, %s5981_s25  }
  0x29   : > { %p5270_p12 = pnand %p5269_p11, %p5263_p8 }
  0x2b   : > { %5273 = shalt.err (!%p5270_p12)
}
  0x2c   : > { %s5992_s4 = sld [smem:[#allocation25_spill]]  ;;  %s5285_s14 = scalar_lea.vmem %s5622_s21, 16 }
  0x2d   : > { %p5286_p13 = scmp.ne.s32.totalorder %s5622_s21, %s5285_s14  ;;  %s5292_s17 = scalar_lea.vmem %s5622_s21, 32 }
  0x2e   : > { %p5293_p5 = scmp.lt.s32.totalorder %s5622_s21, %s5622_s21  ;;  %p5294_p8 = scmp.lt.s32.totalorder %s5292_s17, %s5285_s14 }
  0x2f   : > { %p5288_p0 = pnand %p5286_p13, %p5626_p7 }
  0x30   : > { %p5295_p9 = por %p5294_p8, %p5293_p5 }
  0x31   : > { %p5289_p2 = pneg %p5288_p0 }
  0x32   : > { %4532 = dma.hbm_to_vmem [thread:$0]  (!%p5618_p6), %s5992_s4, 96, %s299_s18, [#allocation9]  }
  0x33   : > { %p5296_p10 = pnand %p5295_p9, %p5289_p2 }
  0x35   : > { %5299 = shalt.err (!%p5296_p10)
}
  0x36   : > { %4538 = dma.hbm_to_vmem [thread:$0]  (!%p5618_p6), %s5975_s6, 16, %s5622_s21, [#allocation12]  }
  0x37   : > { %s5519_s18 = smov [#allocation7]   ;;  %s5520_s27 = smov [#allocation10]  }
  0x38   : > { %s284_s26 = sshll.u32 %s5519_s18, 4  ;;  %s308_s28 = sshll.u32 %s5520_s27, 4  ;;  %s285_s26 = int_to_ptr.vmem [resolvable:$true] %s284_s26  ;;  %s309_s28 = int_to_ptr.vmem [resolvable:$true] %s308_s28 }
  0x39   : > { %s5311_s29 = scalar_lea.vmem %s285_s26, 36864  ;;  %p5319_p0 = scmp.lt.s32.totalorder %s285_s26, %s285_s26 }
  0x3a   : > { %p5312_p11 = scmp.ne.s32.totalorder %s285_s26, %s5311_s29  ;;  %p5320_p2 = scmp.lt.s32.totalorder %s5311_s29, %s5311_s29 }
  0x3c   : > { %p5314_p12 = pnand %p5312_p11, %p5626_p7  ;;  %p5321_p5 = por %p5320_p2, %p5319_p0 }
  0x3e   : > { %p5315_p13 = pneg %p5314_p12 }
  0x40   : > { %p5322_p8 = pnand %p5321_p5, %p5315_p13 }
  0x42   : > { %5325 = shalt.err (!%p5322_p8)
}
  0x43   : > { %s5993_s3 = sld [smem:[#allocation24_spill]]  ;;  %s5337_s14 = scalar_lea.vmem %s309_s28, 6144 }
  0x44   : > { %p5338_p9 = scmp.ne.s32.totalorder %s309_s28, %s5337_s14  ;;  %p5345_p12 = scmp.lt.s32.totalorder %s309_s28, %s309_s28 }
  0x45   : > { %p5346_p0 = scmp.lt.s32.totalorder %s5337_s14, %s5337_s14 }
  0x46   : > { %p5340_p10 = pnand %p5338_p9, %p5626_p7 }
  0x47   : > { %p5347_p13 = por %p5346_p0, %p5345_p12 }
  0x48   : > { %p5341_p11 = pneg %p5340_p10 }
  0x49   : > { %4529 = dma.hbm_to_vmem [thread:$0]  (!%p5618_p6), %s5993_s3, 36864, %s285_s26, [#allocation6], %s5980_s24, %s5980_s24, %s5981_s25  }
  0x4a   : > { %p5348_p2 = pnand %p5347_p13, %p5341_p11 }
  0x4c   : > { %5351 = shalt.err (!%p5348_p2)
}
  0x4d   : > { %s5521_s17 = smov 64   ;;  %s5522_s20 = smov 4  }
  0x4e   : > { %4535 = dma.hbm_to_vmem [thread:$0]  (!%p5618_p6), %s5974_s5, 6144, %s309_s28, [#allocation9], %s5521_s17, %s5521_s17, %s5522_s20  }
  0x4f   : > { %s5523_s26 = smov [#allocation13]   ;;  %s5524_s29 = smov [#allocation14]  }
  0x50   : > { %s332_s27 = sshll.u32 %s5523_s26, 4  ;;  %s346_s21 = sshll.u32 %s5524_s29, 4  ;;  %s333_s27 = int_to_ptr.vmem [resolvable:$true] %s332_s27  ;;  %s347_s21 = int_to_ptr.vmem [resolvable:$true] %s346_s21 }
  0x51   : > { %s5363_s13 = scalar_lea.vmem %s333_s27, 1024  ;;  %p5371_p10 = scmp.lt.s32.totalorder %s333_s27, %s333_s27 }
  0x52   : > { %p5364_p5 = scmp.ne.s32.totalorder %s333_s27, %s5363_s13  ;;  %p5372_p11 = scmp.lt.s32.totalorder %s5363_s13, %s5363_s13 }
  0x54   : > { %p5366_p8 = pnand %p5364_p5, %p5626_p7  ;;  %p5373_p12 = por %p5372_p11, %p5371_p10 }
  0x56   : > { %p5367_p9 = pneg %p5366_p8 }
  0x58   : > { %p5374_p0 = pnand %p5373_p12, %p5367_p9 }
  0x5a   : > { %5377 = shalt.err (!%p5374_p0)
}
  0x5b   : > { %4541 = dma.hbm_to_vmem [thread:$0]  (!%p5618_p6), %s5976_s7, 1024, %s333_s27, [#allocation12], %s5521_s17, %s5521_s17, %s5522_s20  }
  0x5c   : > { %s5389_s28 = scalar_lea.vmem %s347_s21, 16  ;;  %s5396_s18 = scalar_lea.vmem %s347_s21, 32 }
  0x5d   : > { %p5390_p13 = scmp.ne.s32.totalorder %s347_s21, %s5389_s28  ;;  %p5397_p5 = scmp.lt.s32.totalorder %s347_s21, %s347_s21 }
  0x5e   : > { %p5398_p8 = scmp.lt.s32.totalorder %s5396_s18, %s5389_s28 }
  0x5f   : > { %p5392_p2 = pnand %p5390_p13, %p5626_p7 }
  0x60   : > { %p5399_p1 = por %p5398_p8, %p5397_p5 }
  0x61   : > { %p5393_p4 = pneg %p5392_p2 }
  0x63   : > { %p5400_p10 = pnand %p5399_p1, %p5393_p4 }
  0x65   : > { %5403 = shalt.err (!%p5400_p10)
}
  0x66   : > { %4544 = dma.hbm_to_vmem [thread:$0]  (!%p5618_p6), %s5977_s8, 16, %s347_s21, [#allocation15]  }
  0x67   : > { %s3955_s22 = sadd.s32 4294967294, %s5512_s12   ;;  %s5693_s19 = sadd.s32 1, %s5512_s12  }
  0x68   : > { %s36_s17 = sadd.s32 1, %s5508_s11  ;;  %s33_s20 = ssub.s32 %s5512_s12, %s5693_s19 }
  0x69   : > { %p43_p1 = scmp.ne.s32.totalorder %s5508_s11, %s5504_s10  ;;  %p34_p4 = scmp.eq.s32.totalorder %s33_s20, 0 }
  0x6a   : > { %p44_p7 = scmp.eq.s32.totalorder %s5512_s12, 0  ;;  %p49_p9 = scmp.ne.s32.totalorder %s5504_s10, %s5500_s30 }
  0x6b   : > { %p246_p11 = scmp.eq.s32.totalorder %s5604_s15, 1  ;;  %p5994_p0 = scmp.eq.s32.totalorder %s5604_s15, 0 }
  0x6c   : > { %s5705_s27 = scalar_select %p34_p4, %s5508_s11, %s36_s17  }
  0x6d   : > { %p45_p12 = por %p44_p7, %p43_p1  ;;  %p5709_p13 = por %p5994_p0, %p49_p9 }
  0x6e   : > { %p5713_p6 = por %p246_p11, %p43_p1  ;;  %p252_p2 = scmp.eq.s32.totalorder %s3955_s22, 1 }
  0x6f   : > { %s5995_s13 = scalar_select %p5709_p13, 1, 0 }
  0x70   : > { %s5996_s21 = scalar_select %p5713_p6, 1, 0 }
  0x71   : > { %p4560_p5 = scmp.lt.s32.totalorder %s5512_s12, 2  ;;  %s357_s14 = sand.u32 1, %s5508_s11  }
  0x72   : > { %p5719_p8 = por %p252_p2, %p49_p9  ;;  %s4488_s28 = smul.u32 48, %s357_s14 }
  0x73   : > { %p5723_p10 = pnand %p4560_p5, %p45_p12  ;;  %s4489_s26 = smul.u32 768, %s5512_s12 }
  0x74   : > { %s5997_s23 = scalar_select %p5719_p8, 1, 0 }
  0x75   : > { %s5731_s20 = scalar_lea.hbm %s5969_s0, %s4489_s26  ;;  %s361_s22 = scalar_lea.vmem [#allocation2], %s4488_s28 }
  0x76   : > { %s369_s24 = sshll.u32 %s361_s22, 4  ;;  %s5735_s25 = scalar_lea.sflag [#allocation3], %s357_s14  ;;  %s5733_s24 = int_to_ptr.vmem [resolvable:$true] %s369_s24 }
  0x77   : > { %s5404_s2 = scalar_lea.hbm %s5731_s20, 768  ;;  %p5406_p4 = pneg %p5723_p10 }
  0x78   : > { %p5405_p1 = scmp.ne.s32.totalorder %s5731_s20, %s5404_s2  ;;  %s5409_s26 = scalar_lea.hbm %s5969_s0, 1536 }
  0x79   : > { %p5410_p11 = scmp.lt.s32.totalorder %s5731_s20, %s5969_s0  ;;  %p5411_p12 = scmp.lt.s32.totalorder %s5409_s26, %s5404_s2 }
  0x7a   : > { %p5407_p7 = pnand %p5406_p4, %p5405_p1 }
  0x7b   : > { %p5412_p0 = por %p5411_p12, %p5410_p11 }
  0x7c   : > { %p5408_p9 = pneg %p5407_p7 }
  0x7e   : > { %p5413_p2 = pnand %p5412_p0, %p5408_p9 }
  0x80   : > { %5416 = shalt.err (!%p5413_p2)
}
  0x81   : > { %s5417_s14 = scalar_lea.vmem %s5733_s24, 768  ;;  %s5525_s28 = smov [#allocation2]  }
  0x82   : > { %p5418_p5 = scmp.ne.s32.totalorder %s5733_s24, %s5417_s14  ;;  %s5422_s22 = sshll.u32 %s5525_s28, 4  ;;  %s5423_s22 = int_to_ptr.vmem [resolvable:$false] %s5422_s22 }
  0x83   : > { %s5424_s3 = scalar_lea.vmem %s5423_s22, 1536  ;;  %p5425_p7 = scmp.lt.s32.totalorder %s5733_s24, %s5423_s22 }
  0x84   : > { %p5420_p8 = pnand %p5418_p5, %p5406_p4  ;;  %p5426_p6 = scmp.lt.s32.totalorder %s5424_s3, %s5417_s14 }
  0x86   : > { %p5421_p1 = pneg %p5420_p8  ;;  %p5427_p13 = por %p5426_p6, %p5425_p7 }
  0x88   : > { %p5428_p3 = pnand %p5427_p13, %p5421_p1 }
  0x8a   : > { %5431 = shalt.err (!%p5428_p3)
}
  0x8b   : > { %s5999_s2 = smov 24   ;;  %s6000_s4 = smov 384  }
  0x8c   : > { %4548 = dma.hbm_to_vmem [thread:$0]  (!%p5723_p10), %s5731_s20, 768, %s5733_s24, %s5735_s25, %s6000_s4, %s6000_s4, %s5999_s2  }
  0x8d   : > { %p6001_p8 = scmp.ne.s32.totalorder %s5988_s16, 0 }
  0x8e   : > { %s5762_s26 = sand.u32 (!%p6001_p8), 1, %s5504_s10   ;;  %p6002_p3 = scmp.ne.s32.totalorder (!%p6001_p8), %s5995_s13, 0 }
  0x8f   : > { %390 = sbr.rel (%p6001_p8) target bundleno = 1327 (0x52f), region = 56  ;;  %s393_s17 = scalar_lea.sflag (!%p6001_p8), [#allocation3], %s5762_s26 }
  0x90   : > { %s4490_s29 = smul.u32 (!%p6001_p8), 48, %s5762_s26 }
  0x92   : > { %s5766_s14 = scalar_lea.vmem (!%p6001_p8), [#allocation2], %s4490_s29 }
  0x94   : > { %5475 = dma.done.wait (%p6002_p3), %s393_s17, 768  }
  0x95   : > { %5477 = vsyncadd (%p6002_p3), %s393_s17, 4294966528  ;;  %p6003_p13 = scmp.eq.s32.totalorder %s5604_s15, 0 }
  0x97   : > { %5479 = dma.done.wait (%p6003_p13), [#allocation6], 43008   ;;  %p6004_p6 = pmov %p6003_p13 }
  0x99   : > { %5481 = vsyncadd (%p6004_p6), [#allocation6], 4294924288  ;;  %p6005_p10 = pmov %p6004_p6 }
  0x9a   : > { %p6006_p4 = pmov %p6004_p6 }
  0x9b   : > { %5483 = dma.done.wait (%p6005_p10), [#allocation9], 6240  }
  0x9c   : > { %5485 = vsyncadd (%p6006_p4), [#allocation9], 4294961056  ;;  %p6007_p9 = pmov %p6006_p4 }
  0x9d   : > { %p6008_p11 = pmov %p6006_p4 }
  0x9e   : > { %5487 = dma.done.wait (%p6007_p9), [#allocation12], 1040  }
  0x9f   : > { %5489 = vsyncadd (%p6008_p11), [#allocation12], 4294966256  ;;  %p6009_p12 = pmov %p6006_p4 }
  0xa0   : > { %p6010_p0 = pmov %p6006_p4 }
  0xa1   : > { %5491 = dma.done.wait (%p6009_p12), [#allocation15], 16  }
  0xa2   : > { %5493 = vsyncadd (%p6010_p0), [#allocation15], 4294967280  ;;  %v4619_v0 = vld [vmem:[#allocation7 + $0x154] ss:$24 sps:$4 sm:$0xff]   ;;  %v4623_v2 = vld [vmem:[#allocation7 + $0x150] ss:$24 sps:$4 sm:$0xff]  }
  0xa3   : > { %v4621_v1 = vld [vmem:[#allocation7 + $0x454] ss:$24 sps:$4 sm:$0xff]   ;;  %2269 = vmatprep.subr.bf16.mxu0 %v4619_v0  ;;  %v4624_v3 = vld [vmem:[#allocation7 + $0x450] ss:$24 sps:$4 sm:$0xff]   ;;  %v4625_v4 = vld [vmem:[#allocation7 + $0x124] ss:$24 sps:$4 sm:$0xff]  }
  0xa4   : > { %2312 = vmatprep.subr.bf16.mxu1 %v4621_v1  ;;  %2270 = vmatpush1.bf16.msra.mxu0 %v4623_v2  ;;  %v4627_v5 = vld [vmem:[#allocation7 + $0x424] ss:$24 sps:$4 sm:$0xff]   ;;  %v4629_v6 = vld [vmem:[#allocation7 + $0x120] ss:$24 sps:$4 sm:$0xff]   ;;  %v4631_v8 = vld [vmem:[#allocation7 + $0xf4] ss:$24 sps:$4 sm:$0xff]  }
  0xa5   : > { %2313 = vmatpush1.bf16.msra.mxu1 %v4624_v3  ;;  %2271 = vmatprep.subr.bf16.mxu0 %v4625_v4  ;;  %v4630_v7 = vld [vmem:[#allocation7 + $0x420] ss:$24 sps:$4 sm:$0xff]   ;;  %v4633_v9 = vld [vmem:[#allocation7 + $0x3f4] ss:$24 sps:$4 sm:$0xff]   ;;  %v4635_v10 = vld [vmem:[#allocation7 + $0xf0] ss:$24 sps:$4 sm:$0xff]  }
  0xa6   : > { %2314 = vmatprep.subr.bf16.mxu1 %v4627_v5  ;;  %v4636_v11 = vld [vmem:[#allocation7 + $0x3f0] ss:$24 sps:$4 sm:$0xff]   ;;  %v4637_v12 = vld [vmem:[#allocation7 + $0xc4] ss:$24 sps:$4 sm:$0xff]   ;;  %v4641_v14 = vld [vmem:[#allocation7 + $0xc0] ss:$24 sps:$4 sm:$0xff]  }
  0xa7   : > { %v4639_v13 = vld [vmem:[#allocation7 + $0x3c4] ss:$24 sps:$4 sm:$0xff]   ;;  %v4642_v15 = vld [vmem:[#allocation7 + $0x3c0] ss:$24 sps:$4 sm:$0xff]   ;;  %v4643_v16 = vld [vmem:[#allocation7 + $0x94] ss:$24 sps:$4 sm:$0xff]  }
  0xa8   : > { %2272 = vmatpush1.bf16.msra.mxu0 %v4629_v6  ;;  %v4645_v17 = vld [vmem:[#allocation7 + $0x394] ss:$24 sps:$4 sm:$0xff]   ;;  %v4647_v18 = vld [vmem:[#allocation7 + $0x90] ss:$24 sps:$4 sm:$0xff]   ;;  %v4649_v20 = vld [vmem:[#allocation7 + $0x64] ss:$24 sps:$4 sm:$0xff]  }
  0xa9   : > { %2315 = vmatpush1.bf16.msra.mxu1 %v4630_v7  ;;  %2273 = vmatprep.subr.bf16.mxu0 %v4631_v8  ;;  %v4648_v19 = vld [vmem:[#allocation7 + $0x390] ss:$24 sps:$4 sm:$0xff]   ;;  %v4651_v21 = vld [vmem:[#allocation7 + $0x364] ss:$24 sps:$4 sm:$0xff]   ;;  %v4653_v22 = vld [vmem:[#allocation7 + $0x60] ss:$24 sps:$4 sm:$0xff]  }
  0xaa   : > { %2316 = vmatprep.subr.bf16.mxu1 %v4633_v9  ;;  %v4654_v23 = vld [vmem:[#allocation7 + $0x360] ss:$24 sps:$4 sm:$0xff]   ;;  %v4655_v24 = vld [vmem:[#allocation7 + $0x34] ss:$24 sps:$4 sm:$0xff]   ;;  %v4659_v26 = vld [vmem:[#allocation7 + $0x30] ss:$24 sps:$4 sm:$0xff]  }
  0xab   : > { %v4657_v25 = vld [vmem:[#allocation7 + $0x334] ss:$24 sps:$4 sm:$0xff]   ;;  %v4660_v27 = vld [vmem:[#allocation7 + $0x330] ss:$24 sps:$4 sm:$0xff]   ;;  %v4661_v28 = vld [vmem:[#allocation7 + $0x4] ss:$24 sps:$4 sm:$0xff]  }
  0xac   : > { %2274 = vmatpush1.bf16.msra.mxu0 %v4635_v10  ;;  %v4663_v29 = vld [vmem:[#allocation7 + $0x304] ss:$24 sps:$4 sm:$0xff]   ;;  %v4665_v30 = vld [vmem:[#allocation7] ss:$24 sps:$4 sm:$0xff]   ;;  %v4667_v32 = vld [vmem:[#allocation7 + $0x2d4] ss:$24 sps:$4 sm:$0xff]  }
  0xad   : > { %2317 = vmatpush1.bf16.msra.mxu1 %v4636_v11  ;;  %2275 = vmatprep.subr.bf16.mxu0 %v4637_v12  ;;  %v4666_v31 = vld [vmem:[#allocation7 + $0x300] ss:$24 sps:$4 sm:$0xff]   ;;  %v4669_v33 = vld [vmem:[#allocation7 + $0x5d4] ss:$24 sps:$4 sm:$0xff]   ;;  %v5526_v34 = vmov 0   ;;  %s3977_s16 = sshll.u32 %s5604_s15, 1 }
  0xae   : > { %2318 = vmatprep.subr.bf16.mxu1 %v4639_v13  ;;  %4618 = vset.pattern.permute.xlu0 %v5526_v34  ;;  %v4671_v35 = vld [vmem:[#allocation7 + $0x2d0] ss:$24 sps:$4 sm:$0xff]   ;;  %v4673_v37 = vld [vmem:[#allocation7 + $0x2a4] ss:$24 sps:$4 sm:$0xff]   ;;  %v4677_v39 = vld [vmem:[#allocation7 + $0x2a0] ss:$24 sps:$4 sm:$0xff]  }
  0xaf   : > { %v4672_v36 = vld [vmem:[#allocation7 + $0x5d0] ss:$24 sps:$4 sm:$0xff]   ;;  %v4675_v38 = vld [vmem:[#allocation7 + $0x5a4] ss:$24 sps:$4 sm:$0xff]   ;;  %v4678_v40 = vld [vmem:[#allocation7 + $0x5a0] ss:$24 sps:$4 sm:$0xff]  }
  0xb0   : > { %2276 = vmatpush1.bf16.msra.mxu0 %v4641_v14  ;;  %v4679_v41 = vld [vmem:[#allocation7 + $0x274] ss:$24 sps:$4 sm:$0xff]   ;;  %v4683_v43 = vld [vmem:[#allocation7 + $0x270] ss:$24 sps:$4 sm:$0xff]   ;;  %v4685_v45 = vld [vmem:[#allocation7 + $0x244] ss:$24 sps:$4 sm:$0xff]  }
  0xb1   : > { %2319 = vmatpush1.bf16.msra.mxu1 %v4642_v15  ;;  %2277 = vmatprep.subr.bf16.mxu0 %v4643_v16  ;;  %v4681_v42 = vld [vmem:[#allocation7 + $0x574] ss:$24 sps:$4 sm:$0xff]   ;;  %v4684_v44 = vld [vmem:[#allocation7 + $0x570] ss:$24 sps:$4 sm:$0xff]   ;;  %v4687_v46 = vld [vmem:[#allocation7 + $0x544] ss:$24 sps:$4 sm:$0xff]  }
  0xb2   : > { %2320 = vmatprep.subr.bf16.mxu1 %v4645_v17  ;;  %v4689_v47 = vld [vmem:[#allocation7 + $0x240] ss:$24 sps:$4 sm:$0xff]   ;;  %v4691_v49 = vld [vmem:[#allocation7 + $0x214] ss:$24 sps:$4 sm:$0xff]   ;;  %v4695_v53 = vld [vmem:[#allocation7 + $0x210] ss:$24 sps:$4 sm:$0xff]  }
  0xb3   : > { %v4690_v48 = vld [vmem:[#allocation7 + $0x540] ss:$24 sps:$4 sm:$0xff]   ;;  %v4715_v50 = vld [vmem:[%s5766_s14 + $0x4] ss:$24 sps:$4 sm:$0xff]   ;;  %v4696_v54 = vld [vmem:[#allocation7 + $0x510] ss:$24 sps:$4 sm:$0xff]  }
  0xb4   : > { %2278 = vmatpush1.bf16.msra.mxu0 %v4647_v18  ;;  %v5791_v51 = vld [vmem:[%s5766_s14 + $0xc] ss:$24 sps:$4 sm:$0xff]   ;;  %2301 = vmatprep.mubr.bf16.mxu0 %v4715_v50  ;;  %v4701_v57 = vld [vmem:[#allocation7 + $0x1e0] ss:$24 sps:$4 sm:$0xff]   ;;  %v4707_v61 = vld [vmem:[#allocation7 + $0x1b0] ss:$24 sps:$4 sm:$0xff]  }
  0xb5   : > { %2321 = vmatpush1.bf16.msra.mxu1 %v4648_v19  ;;  %2279 = vmatprep.subr.bf16.mxu0 %v4649_v20  ;;  %v4693_v52 = vld [vmem:[#allocation7 + $0x514] ss:$24 sps:$4 sm:$0xff]   ;;  %v4697_v55 = vld [vmem:[#allocation7 + $0x1e4] ss:$24 sps:$4 sm:$0xff]   ;;  %v4702_v58 = vld [vmem:[#allocation7 + $0x4e0] ss:$24 sps:$4 sm:$0xff]  }
  0xb6   : > { %2322 = vmatprep.subr.bf16.mxu1 %v4651_v21  ;;  %2344 = vmatprep.mubr.bf16.mxu1 %v5791_v51  ;;  %v4699_v56 = vld [vmem:[#allocation7 + $0x4e4] ss:$24 sps:$4 sm:$0xff]   ;;  %v4703_v59 = vld [vmem:[#allocation7 + $0x1b4] ss:$24 sps:$4 sm:$0xff]   ;;  %v4708_v62 = vld [vmem:[#allocation7 + $0x4b0] ss:$24 sps:$4 sm:$0xff]  }
  0xb7   : > { %v4705_v60 = vld [vmem:[#allocation7 + $0x4b4] ss:$24 sps:$4 sm:$0xff]   ;;  %v4709_v63 = vld [vmem:[#allocation7 + $0x184] ss:$24 sps:$4 sm:$0xff]   ;;  %v4713_v1 = vld [vmem:[#allocation7 + $0x180] ss:$24 sps:$4 sm:$0xff]  }
  0xb8   : > { %2280 = vmatpush1.bf16.msra.mxu0 %v4653_v22  ;;  %v4711_v0 = vld [vmem:[#allocation7 + $0x484] ss:$24 sps:$4 sm:$0xff]   ;;  %v4714_v2 = vld [vmem:[#allocation7 + $0x480] ss:$24 sps:$4 sm:$0xff]   ;;  %v4722_v3 = vld [vmem:[#allocation7 + $0x754] ss:$24 sps:$4 sm:$0xff]  }
  0xb9   : > { %2323 = vmatpush1.bf16.msra.mxu1 %v4654_v23  ;;  %2281 = vmatprep.subr.bf16.mxu0 %v4655_v24  ;;  %v4725_v4 = vld [vmem:[#allocation7 + $0x15c] ss:$24 sps:$4 sm:$0xff]   ;;  %v5795_v5 = vld [vmem:[%s5766_s14] ss:$24 sps:$4 sm:$0xff]   ;;  %v4732_v10 = vld [vmem:[#allocation7 + $0x12c] ss:$24 sps:$4 sm:$0xff]  }
  0xba   : > { %2324 = vmatprep.subr.bf16.mxu1 %v4657_v25  ;;  %v4720_v6 = vld [vmem:[#allocation7 + $0x750] ss:$24 sps:$4 sm:$0xff]   ;;  %v4729_v9 = vld [vmem:[#allocation7 + $0x724] ss:$24 sps:$4 sm:$0xff]   ;;  %v4727_v11 = vld [vmem:[#allocation7 + $0x720] ss:$24 sps:$4 sm:$0xff]  }
  0xbb   : > { %v4723_v7 = vld [vmem:[#allocation7 + $0x158] ss:$24 sps:$4 sm:$0xff]   ;;  %v4730_v12 = vld [vmem:[#allocation7 + $0x128] ss:$24 sps:$4 sm:$0xff]   ;;  %v4735_v13 = vld [vmem:[#allocation7 + $0x6f4] ss:$24 sps:$4 sm:$0xff]  }
  0xbc   : > { %2282 = vmatpush1.bf16.msra.mxu0 %v4659_v26  ;;  %v5798_v8 = vld [vmem:[%s5766_s14 + $0x8] ss:$24 sps:$4 sm:$0xff]   ;;  %v4738_v14 = vld [vmem:[#allocation7 + $0xfc] ss:$24 sps:$4 sm:$0xff]   ;;  %v4744_v18 = vld [vmem:[#allocation7 + $0xcc] ss:$24 sps:$4 sm:$0xff]  }
  0xbd   : > { %2325 = vmatpush1.bf16.msra.mxu1 %v4660_v27  ;;  %2283 = vmatprep.subr.bf16.mxu0 %v4661_v28  ;;  %v4733_v15 = vld [vmem:[#allocation7 + $0x6f0] ss:$24 sps:$4 sm:$0xff]   ;;  %v4741_v17 = vld [vmem:[#allocation7 + $0x6c4] ss:$24 sps:$4 sm:$0xff]   ;;  %v4739_v19 = vld [vmem:[#allocation7 + $0x6c0] ss:$24 sps:$4 sm:$0xff]  }
  0xbe   : > { %2326 = vmatprep.subr.bf16.mxu1 %v4663_v29  ;;  %v4736_v16 = vld [vmem:[#allocation7 + $0xf8] ss:$24 sps:$4 sm:$0xff]   ;;  %v4742_v20 = vld [vmem:[#allocation7 + $0xc8] ss:$24 sps:$4 sm:$0xff]   ;;  %v4747_v21 = vld [vmem:[#allocation7 + $0x694] ss:$24 sps:$4 sm:$0xff]  }
  0xbf   : > { %v4750_v22 = vld [vmem:[#allocation7 + $0x9c] ss:$24 sps:$4 sm:$0xff]   ;;  %v4745_v23 = vld [vmem:[#allocation7 + $0x690] ss:$24 sps:$4 sm:$0xff]   ;;  %v4756_v26 = vld [vmem:[#allocation7 + $0x6c] ss:$24 sps:$4 sm:$0xff]  }
  0xc0   : > { %2284 = vmatpush1.bf16.msra.mxu0 %v4665_v30  ;;  %v4748_v24 = vld [vmem:[#allocation7 + $0x98] ss:$24 sps:$4 sm:$0xff]   ;;  %v4753_v25 = vld [vmem:[#allocation7 + $0x664] ss:$24 sps:$4 sm:$0xff]   ;;  %v4754_v28 = vld [vmem:[#allocation7 + $0x68] ss:$24 sps:$4 sm:$0xff]  }
  0xc1   : > { %2327 = vmatpush1.bf16.msra.mxu1 %v4666_v31  ;;  %2285 = vmatprep.subr.bf16.mxu0 %v4667_v32  ;;  %v4751_v27 = vld [vmem:[#allocation7 + $0x660] ss:$24 sps:$4 sm:$0xff]   ;;  %v4759_v29 = vld [vmem:[#allocation7 + $0x634] ss:$24 sps:$4 sm:$0xff]   ;;  %v4757_v31 = vld [vmem:[#allocation7 + $0x630] ss:$24 sps:$4 sm:$0xff]  }
  0xc2   : > { %2328 = vmatprep.subr.bf16.mxu1 %v4669_v33  ;;  %v4762_v30 = vld [vmem:[#allocation7 + $0x3c] ss:$24 sps:$4 sm:$0xff]   ;;  %v4760_v32 = vld [vmem:[#allocation7 + $0x38] ss:$24 sps:$4 sm:$0xff]   ;;  %p466_p2 = scmp.lt.s32.totalorder %s3977_s16, 3  ;;  %vm5529_vm3 = vmmov 0  }
  0xc3   : > { %v4765_v33 = vld [vmem:[#allocation7 + $0x604] ss:$24 sps:$4 sm:$0xff]   ;;  %s3976_s20 = sshll.u32 %s5762_s26, 4  ;;  %s4392_s3 = sshll.u32 %s5604_s15, 8 }
  0xc4   : > { %2286 = vmatpush2.bf16.msra.mxu0 %v4671_v35  ;;  %v4768_v35 = vld [vmem:[#allocation7 + $0xc] ss:$24 sps:$4 sm:$0xff]   ;;  %s6021_s16 = smov (!%p466_p2, %s3977_s16), 3  ;;  %s463_s28 = scalar_lea.vmem [#allocation16], %s3976_s20 }
  0xc5   : > { %2329 = vmatpush2.bf16.msra.mxu1 %v4672_v36  ;;  %2287 = vmatprep.subr.bf16.mxu0 %v4673_v37  ;;  %v5803_v36 = vld [vmem:[%s5766_s14 + $0x14] ss:$24 sps:$4 sm:$0xff]   ;;  %v4763_v37 = vld [vmem:[#allocation7 + $0x600] ss:$24 sps:$4 sm:$0xff]   ;;  %s3978_s24 = sshll.u32 %s6021_s16, 3  ;;  %s3803_s22 = sshll.u32 %s463_s28, 4  ;;  %s5921_s22 = int_to_ptr.vmem [resolvable:$true] %s3803_s22 }
  0xc6   : > { %2330 = vmatprep.subr.bf16.mxu1 %v4675_v38  ;;  %v4766_v38 = vld [vmem:[#allocation7 + $0x8] ss:$24 sps:$4 sm:$0xff]   ;;  %s469_s18 = scalar_lea.vmem %s5970_s1, %s3978_s24  ;;  %s5926_s29 = scalar_lea.hbm %s5978_s9, %s4392_s3 }
  0xc7   : > { %s3790_s17 = scalar_lea.sflag [#allocation4], %s5762_s26  ;;  %p6013_p1 = scmp.ne.s32.totalorder %s5996_s21, 0 }
  0xc8   : > { %2288 = vmatpush2.bf16.msra.mxu0 %v4677_v39  ;;  %v4771_v39 = vld [vmem:[#allocation7 + $0x8d4] ss:$24 sps:$4 sm:$0xff]   ;;  %s5530_s15 = smov [#allocation16]  }
  0xc9   : > { %2331 = vmatpush2.bf16.msra.mxu1 %v4678_v40  ;;  %2289 = vmatprep.subr.bf16.mxu0 %v4679_v41  ;;  %v4774_v40 = vld [vmem:[#allocation7 + $0x2dc] ss:$24 sps:$4 sm:$0xff]   ;;  %v4769_v41 = vld [vmem:[#allocation7 + $0x8d0] ss:$24 sps:$4 sm:$0xff]   ;;  %s5436_s16 = sshll.u32 %s5530_s15, 4  ;;  %s5437_s16 = int_to_ptr.vmem [resolvable:$false] %s5436_s16 }
  0xca   : > { %2332 = vmatprep.subr.bf16.mxu1 %v4681_v42  ;;  %v4772_v42 = vld [vmem:[#allocation7 + $0x2d8] ss:$24 sps:$4 sm:$0xff]   ;;  %s5438_s24 = scalar_lea.vmem %s5437_s16, 512  ;;  %p5439_p3 = scmp.lt.s32.totalorder %s5921_s22, %s5437_s16 }
  0xcc   : > { %2290 = vmatpush2.bf16.msra.mxu0 %v4683_v43  ;;  %v4777_v43 = vld [vmem:[#allocation7 + $0x8a4] ss:$24 sps:$4 sm:$0xff]  }
  0xcd   : > { %2333 = vmatpush2.bf16.msra.mxu1 %v4684_v44  ;;  %2291 = vmatprep.subr.bf16.mxu0 %v4685_v45  ;;  %v4780_v44 = vld [vmem:[#allocation7 + $0x2ac] ss:$24 sps:$4 sm:$0xff]   ;;  %v4775_v45 = vld [vmem:[#allocation7 + $0x8a0] ss:$24 sps:$4 sm:$0xff]  }
  0xce   : > { %2334 = vmatprep.subr.bf16.mxu1 %v4687_v46  ;;  %v4778_v46 = vld [vmem:[#allocation7 + $0x2a8] ss:$24 sps:$4 sm:$0xff]  }
  0xd0   : > { %2292 = vmatpush2.bf16.msra.mxu0 %v4689_v47  ;;  %v4783_v47 = vld [vmem:[#allocation7 + $0x874] ss:$24 sps:$4 sm:$0xff]  }
  0xd1   : > { %2335 = vmatpush2.bf16.msra.mxu1 %v4690_v48  ;;  %2293 = vmatprep.subr.bf16.mxu0 %v4691_v49  ;;  %v4786_v48 = vld [vmem:[#allocation7 + $0x27c] ss:$24 sps:$4 sm:$0xff]   ;;  %v4781_v49 = vld [vmem:[#allocation7 + $0x870] ss:$24 sps:$4 sm:$0xff]  }
  0xd2   : > { %2336 = vmatprep.subr.bf16.mxu1 %v4693_v52  ;;  %v4789_v52 = vld [vmem:[#allocation7 + $0x844] ss:$24 sps:$4 sm:$0xff]  }
  0xd4   : > { %2294 = vmatpush2.bf16.msra.mxu0 %v4695_v53  ;;  %v4792_v53 = vld [vmem:[#allocation7 + $0x24c] ss:$24 sps:$4 sm:$0xff]  }
  0xd5   : > { %2337 = vmatpush2.bf16.msra.mxu1 %v4696_v54  ;;  %2295 = vmatprep.subr.bf16.mxu0 %v4697_v55  ;;  %v4787_v54 = vld [vmem:[#allocation7 + $0x840] ss:$24 sps:$4 sm:$0xff]  }
  0xd6   : > { %2338 = vmatprep.subr.bf16.mxu1 %v4699_v56  ;;  %v4790_v55 = vld [vmem:[#allocation7 + $0x248] ss:$24 sps:$4 sm:$0xff]   ;;  %v4795_v56 = vld [vmem:[#allocation7 + $0x814] ss:$24 sps:$4 sm:$0xff]  }
  0xd8   : > { %2296 = vmatpush2.bf16.msra.mxu0 %v4701_v57  ;;  %v4798_v57 = vld [vmem:[#allocation7 + $0x21c] ss:$24 sps:$4 sm:$0xff]  }
  0xd9   : > { %2339 = vmatpush2.bf16.msra.mxu1 %v4702_v58  ;;  %2297 = vmatprep.subr.bf16.mxu0 %v4703_v59  ;;  %v2670_v58 = vld [vmem:[%s469_s18] sm:$0xff]  ;;  %v4793_v59 = vld [vmem:[#allocation7 + $0x810] ss:$24 sps:$4 sm:$0xff]  }
  0xda   : > { %2340 = vmatprep.subr.bf16.mxu1 %v4705_v60  ;;  %2673 = vperm.xlu0 %4618, %v2670_v58   ;;  %v4796_v60 = vld [vmem:[#allocation7 + $0x218] ss:$24 sps:$4 sm:$0xff]   ;;  %v4891_v58 = vld [vmem:[#allocation7 + $0x84c] ss:$24 sps:$4 sm:$0xff]  }
  0xdc   : > { %2298 = vmatpush2.bf16.msra.mxu0 %v4707_v61  ;;  %v4801_v61 = vld [vmem:[#allocation7 + $0x7e4] ss:$24 sps:$4 sm:$0xff]  }
  0xdd   : > { %2341 = vmatpush2.bf16.msra.mxu1 %v4708_v62  ;;  %2299 = vmatprep.subr.bf16.mxu0 %v4709_v63  ;;  %v4804_v62 = vld [vmem:[#allocation7 + $0x1ec] ss:$24 sps:$4 sm:$0xff]  }
  0xde   : > { %2342 = vmatprep.subr.bf16.mxu1 %v4711_v0  ;;  %v2671_v63 = vld [vmem:[%s469_s18 + $0x8] sm:$0xff]  ;;  %v4799_v0 = vld [vmem:[#allocation7 + $0x7e0] ss:$24 sps:$4 sm:$0xff]  }
  0xdf   : > { %2676 = vperm.xlu0 %4618, %v2671_v63   ;;  %v4892_v63 = vld [vmem:[#allocation7 + $0x518] ss:$24 sps:$4 sm:$0xff]  }
  0xe0   : > { %2300 = vmatpush2.bf16.msra.mxu0 %v4713_v1  ;;  %v4802_v1 = vld [vmem:[#allocation7 + $0x1e8] ss:$24 sps:$4 sm:$0xff]  }
  0xe1   : > { %2343 = vmatpush2.bf16.msra.mxu1 %v4714_v2  ;;  %2355 = vmatprep.subr.bf16.mxu0 %v4722_v3  ;;  %v4807_v2 = vld [vmem:[#allocation7 + $0x7b4] ss:$24 sps:$4 sm:$0xff]  }
  0xe2   : > { %2398 = vmatprep.subr.bf16.mxu1 %v4725_v4  ;;  %v4810_v3 = vld [vmem:[#allocation7 + $0x1bc] ss:$24 sps:$4 sm:$0xff]   ;;  %v4805_v4 = vld [vmem:[#allocation7 + $0x7b0] ss:$24 sps:$4 sm:$0xff]  }
  0xe3   : > { %2302 = vmatmul.mubr.bf16.vlgmr.msra.gmra.mxu0 %v5795_v5 }
  0xe4   : > { %2345 = vmatmul.mubr.bf16.vlgmr.msra.gmra.mxu1 %v5798_v8  ;;  %2356 = vmatpush1.bf16.msra.mxu0 %v4720_v6  ;;  %v4808_v6 = vld [vmem:[#allocation7 + $0x1b8] ss:$24 sps:$4 sm:$0xff]  }
  0xe5   : > { %2399 = vmatpush1.bf16.msra.mxu1 %v4723_v7  ;;  %2357 = vmatprep.subr.bf16.mxu0 %v4729_v9  ;;  %v4813_v7 = vld [vmem:[#allocation7 + $0x784] ss:$24 sps:$4 sm:$0xff]  }
  0xe6   : > { %2400 = vmatprep.subr.bf16.mxu1 %v4732_v10  ;;  %2430 = vmatprep.mubr.bf16.mxu1 %v4715_v50  ;;  %v4784_v50 = vld [vmem:[#allocation7 + $0x278] ss:$24 sps:$4 sm:$0xff]   ;;  %v4816_v9 = vld [vmem:[#allocation7 + $0x18c] ss:$24 sps:$4 sm:$0xff]  }
  0xe7   : > { %2387 = vmatprep.mubr.bf16.mxu0 %v5803_v36  ;;  %v4811_v10 = vld [vmem:[#allocation7 + $0x780] ss:$24 sps:$4 sm:$0xff]  }
  0xe8   : > { %2358 = vmatpush1.bf16.msra.mxu0 %v4727_v11  ;;  %v4814_v11 = vld [vmem:[#allocation7 + $0x188] ss:$24 sps:$4 sm:$0xff]  }
  0xe9   : > { %2401 = vmatpush1.bf16.msra.mxu1 %v4730_v12  ;;  %2359 = vmatprep.subr.bf16.mxu0 %v4735_v13  ;;  %v4822_v12 = vld [vmem:[#allocation7 + $0x45c] ss:$24 sps:$4 sm:$0xff]  }
  0xea   : > { %2402 = vmatprep.subr.bf16.mxu1 %v4738_v14  ;;  %v4825_v13 = vld [vmem:[#allocation7 + $0x75c] ss:$24 sps:$4 sm:$0xff]   ;;  %v5811_v14 = vld [vmem:[%s5766_s14 + $0x10] ss:$24 sps:$4 sm:$0xff]  }
  0xec   : > { %2360 = vmatpush1.bf16.msra.mxu0 %v4733_v15  ;;  %v4820_v15 = vld [vmem:[#allocation7 + $0x458] ss:$24 sps:$4 sm:$0xff]  }
  0xed   : > { %2403 = vmatpush1.bf16.msra.mxu1 %v4736_v16  ;;  %2361 = vmatprep.subr.bf16.mxu0 %v4741_v17  ;;  %v4823_v16 = vld [vmem:[#allocation7 + $0x758] ss:$24 sps:$4 sm:$0xff]   ;;  %v4828_v17 = vld [vmem:[#allocation7 + $0x42c] ss:$24 sps:$4 sm:$0xff]  }
  0xee   : > { %2404 = vmatprep.subr.bf16.mxu1 %v4744_v18  ;;  %v4831_v18 = vld [vmem:[#allocation7 + $0x72c] ss:$24 sps:$4 sm:$0xff]  }
  0xf0   : > { %2362 = vmatpush1.bf16.msra.mxu0 %v4739_v19  ;;  %v4826_v19 = vld [vmem:[#allocation7 + $0x428] ss:$24 sps:$4 sm:$0xff]  }
  0xf1   : > { %2405 = vmatpush1.bf16.msra.mxu1 %v4742_v20  ;;  %2363 = vmatprep.subr.bf16.mxu0 %v4747_v21  ;;  %v4829_v20 = vld [vmem:[#allocation7 + $0x728] ss:$24 sps:$4 sm:$0xff]   ;;  %v4834_v21 = vld [vmem:[#allocation7 + $0x3fc] ss:$24 sps:$4 sm:$0xff]  }
  0xf2   : > { %2406 = vmatprep.subr.bf16.mxu1 %v4750_v22  ;;  %v4837_v22 = vld [vmem:[#allocation7 + $0x6fc] ss:$24 sps:$4 sm:$0xff]  }
  0xf4   : > { %2364 = vmatpush1.bf16.msra.mxu0 %v4745_v23  ;;  %v4832_v23 = vld [vmem:[#allocation7 + $0x3f8] ss:$24 sps:$4 sm:$0xff]  }
  0xf5   : > { %2407 = vmatpush1.bf16.msra.mxu1 %v4748_v24  ;;  %2365 = vmatprep.subr.bf16.mxu0 %v4753_v25  ;;  %v4835_v24 = vld [vmem:[#allocation7 + $0x6f8] ss:$24 sps:$4 sm:$0xff]   ;;  %v4840_v25 = vld [vmem:[#allocation7 + $0x3cc] ss:$24 sps:$4 sm:$0xff]  }
  0xf6   : > { %2408 = vmatprep.subr.bf16.mxu1 %v4756_v26  ;;  %v4838_v26 = vld [vmem:[#allocation7 + $0x3c8] ss:$24 sps:$4 sm:$0xff]  }
  0xf8   : > { %2366 = vmatpush1.bf16.msra.mxu0 %v4751_v27  ;;  %v4841_v27 = vld [vmem:[#allocation7 + $0x6c8] ss:$24 sps:$4 sm:$0xff]  }
  0xf9   : > { %2409 = vmatpush1.bf16.msra.mxu1 %v4754_v28  ;;  %2367 = vmatprep.subr.bf16.mxu0 %v4759_v29  ;;  %v4846_v28 = vld [vmem:[#allocation7 + $0x39c] ss:$24 sps:$4 sm:$0xff]  }
  0xfa   : > { %2410 = vmatprep.subr.bf16.mxu1 %v4762_v30  ;;  %v4849_v29 = vld [vmem:[#allocation7 + $0x69c] ss:$24 sps:$4 sm:$0xff]   ;;  %v4847_v30 = vld [vmem:[#allocation7 + $0x698] ss:$24 sps:$4 sm:$0xff]  }
  0xfc   : > { %2368 = vmatpush1.bf16.msra.mxu0 %v4757_v31  ;;  %v4852_v31 = vld [vmem:[#allocation7 + $0x36c] ss:$24 sps:$4 sm:$0xff]  }
  0xfd   : > { %2411 = vmatpush1.bf16.msra.mxu1 %v4760_v32  ;;  %2369 = vmatprep.subr.bf16.mxu0 %v4765_v33  ;;  %v4855_v32 = vld [vmem:[#allocation7 + $0x66c] ss:$24 sps:$4 sm:$0xff]   ;;  %v4850_v33 = vld [vmem:[#allocation7 + $0x368] ss:$24 sps:$4 sm:$0xff]  }
  0xfe   : > { %2412 = vmatprep.subr.bf16.mxu1 %v4768_v35  ;;  %v4853_v35 = vld [vmem:[#allocation7 + $0x668] ss:$24 sps:$4 sm:$0xff]  }
 0x100   : > { %2370 = vmatpush1.bf16.msra.mxu0 %v4763_v37  ;;  %v4861_v37 = vld [vmem:[#allocation7 + $0x63c] ss:$24 sps:$4 sm:$0xff]  }
 0x101   : > { %2413 = vmatpush1.bf16.msra.mxu1 %v4766_v38  ;;  %2371 = vmatprep.subr.bf16.mxu0 %v4771_v39  ;;  %v4856_v38 = vld [vmem:[#allocation7 + $0x338] ss:$24 sps:$4 sm:$0xff]  }
 0x102   : > { %2414 = vmatprep.subr.bf16.mxu1 %v4774_v40  ;;  %v4859_v39 = vld [vmem:[#allocation7 + $0x638] ss:$24 sps:$4 sm:$0xff]   ;;  %v4864_v40 = vld [vmem:[#allocation7 + $0x30c] ss:$24 sps:$4 sm:$0xff]  }
 0x104   : > { %2372 = vmatpush2.bf16.msra.mxu0 %v4769_v41  ;;  %v4867_v41 = vld [vmem:[#allocation7 + $0x60c] ss:$24 sps:$4 sm:$0xff]  }
 0x105   : > { %2415 = vmatpush2.bf16.msra.mxu1 %v4772_v42  ;;  %2373 = vmatprep.subr.bf16.mxu0 %v4777_v43  ;;  %v4862_v42 = vld [vmem:[#allocation7 + $0x308] ss:$24 sps:$4 sm:$0xff]  }
 0x106   : > { %2416 = vmatprep.subr.bf16.mxu1 %v4780_v44  ;;  %v4865_v43 = vld [vmem:[#allocation7 + $0x608] ss:$24 sps:$4 sm:$0xff]   ;;  %v4870_v44 = vld [vmem:[#allocation7 + $0x5dc] ss:$24 sps:$4 sm:$0xff]  }
 0x108   : > { %2374 = vmatpush2.bf16.msra.mxu0 %v4775_v45  ;;  %v4873_v45 = vld [vmem:[#allocation7 + $0x8dc] ss:$24 sps:$4 sm:$0xff]  }
 0x109   : > { %2417 = vmatpush2.bf16.msra.mxu1 %v4778_v46  ;;  %2375 = vmatprep.subr.bf16.mxu0 %v4783_v47  ;;  %v4868_v46 = vld [vmem:[#allocation7 + $0x5d8] ss:$24 sps:$4 sm:$0xff]  }
 0x10a   : > { %2418 = vmatprep.subr.bf16.mxu1 %v4786_v48  ;;  %v4871_v47 = vld [vmem:[#allocation7 + $0x8d8] ss:$24 sps:$4 sm:$0xff]   ;;  %v4876_v48 = vld [vmem:[#allocation7 + $0x5ac] ss:$24 sps:$4 sm:$0xff]  }
 0x10c   : > { %2376 = vmatpush2.bf16.msra.mxu0 %v4781_v49  ;;  %v4879_v49 = vld [vmem:[#allocation7 + $0x8ac] ss:$24 sps:$4 sm:$0xff]  }
 0x10d   : > { %2419 = vmatpush2.bf16.msra.mxu1 %v4784_v50  ;;  %2377 = vmatprep.subr.bf16.mxu0 %v4789_v52  ;;  %v4874_v50 = vld [vmem:[#allocation7 + $0x5a8] ss:$24 sps:$4 sm:$0xff]  }
 0x10e   : > { %2420 = vmatprep.subr.bf16.mxu1 %v4792_v53  ;;  %v4877_v52 = vld [vmem:[#allocation7 + $0x8a8] ss:$24 sps:$4 sm:$0xff]   ;;  %v4882_v53 = vld [vmem:[#allocation7 + $0x57c] ss:$24 sps:$4 sm:$0xff]  }
 0x110   : > { %2378 = vmatpush2.bf16.msra.mxu0 %v4787_v54  ;;  %v4885_v54 = vld [vmem:[#allocation7 + $0x87c] ss:$24 sps:$4 sm:$0xff]  }
 0x111   : > { %2421 = vmatpush2.bf16.msra.mxu1 %v4790_v55  ;;  %2379 = vmatprep.subr.bf16.mxu0 %v4795_v56  ;;  %v4880_v55 = vld [vmem:[#allocation7 + $0x578] ss:$24 sps:$4 sm:$0xff]  }
 0x112   : > { %2422 = vmatprep.subr.bf16.mxu1 %v4798_v57  ;;  %v4883_v56 = vld [vmem:[#allocation7 + $0x878] ss:$24 sps:$4 sm:$0xff]   ;;  %v4888_v57 = vld [vmem:[#allocation7 + $0x54c] ss:$24 sps:$4 sm:$0xff]  }
 0x114   : > { %2380 = vmatpush2.bf16.msra.mxu0 %v4793_v59  ;;  %v4886_v59 = vld [vmem:[#allocation7 + $0x548] ss:$24 sps:$4 sm:$0xff]  }
 0x115   : > { %2423 = vmatpush2.bf16.msra.mxu1 %v4796_v60  ;;  %2381 = vmatprep.subr.bf16.mxu0 %v4801_v61  ;;  %v4889_v60 = vld [vmem:[#allocation7 + $0x848] ss:$24 sps:$4 sm:$0xff]   ;;  %v4894_v61 = vld [vmem:[#allocation7 + $0x51c] ss:$24 sps:$4 sm:$0xff]  }
 0x116   : > { %2424 = vmatprep.subr.bf16.mxu1 %v4804_v62  ;;  %v4897_v62 = vld [vmem:[#allocation7 + $0x81c] ss:$24 sps:$4 sm:$0xff]  }
 0x118   : > { %2382 = vmatpush2.bf16.msra.mxu0 %v4799_v0  ;;  %v4895_v0 = vld [vmem:[#allocation7 + $0x818] ss:$24 sps:$4 sm:$0xff]  }
 0x119   : > { %2425 = vmatpush2.bf16.msra.mxu1 %v4802_v1  ;;  %2383 = vmatprep.subr.bf16.mxu0 %v4807_v2  ;;  %v4900_v1 = vld [vmem:[#allocation7 + $0x4ec] ss:$24 sps:$4 sm:$0xff]  }
 0x11a   : > { %2426 = vmatprep.subr.bf16.mxu1 %v4810_v3  ;;  %v4903_v2 = vld [vmem:[#allocation7 + $0x7ec] ss:$24 sps:$4 sm:$0xff]   ;;  %v4898_v3 = vld [vmem:[#allocation7 + $0x4e8] ss:$24 sps:$4 sm:$0xff]  }
 0x11c   : > { %2384 = vmatpush2.bf16.msra.mxu0 %v4805_v4  ;;  %v4901_v4 = vld [vmem:[#allocation7 + $0x7e8] ss:$24 sps:$4 sm:$0xff]  }
 0x11d   : > { %2427 = vmatpush2.bf16.msra.mxu1 %v4808_v6  ;;  %2385 = vmatprep.subr.bf16.mxu0 %v4813_v7  ;;  %v4906_v6 = vld [vmem:[#allocation7 + $0x4bc] ss:$24 sps:$4 sm:$0xff]  }
 0x11e   : > { %2428 = vmatprep.subr.bf16.mxu1 %v4816_v9  ;;  %v4909_v7 = vld [vmem:[#allocation7 + $0x7bc] ss:$24 sps:$4 sm:$0xff]   ;;  %v4904_v9 = vld [vmem:[#allocation7 + $0x4b8] ss:$24 sps:$4 sm:$0xff]  }
 0x120   : > { %2386 = vmatpush2.bf16.msra.mxu0 %v4811_v10  ;;  %v4907_v10 = vld [vmem:[#allocation7 + $0x7b8] ss:$24 sps:$4 sm:$0xff]  }
 0x121   : > { %2429 = vmatpush2.bf16.msra.mxu1 %v4814_v11  ;;  %2441 = vmatprep.subr.bf16.mxu0 %v4822_v12  ;;  %v4912_v11 = vld [vmem:[#allocation7 + $0x48c] ss:$24 sps:$4 sm:$0xff]  }
 0x122   : > { %2484 = vmatprep.subr.bf16.mxu1 %v4825_v13  ;;  %v4915_v12 = vld [vmem:[#allocation7 + $0x78c] ss:$24 sps:$4 sm:$0xff]   ;;  %v4910_v13 = vld [vmem:[#allocation7 + $0x488] ss:$24 sps:$4 sm:$0xff]  }
 0x123   : > { %2388 = vmatmul.mubr.bf16.vlgmr.msra.gmra.mxu0 %v5811_v14 }
 0x124   : > { %2431 = vmatmul.mubr.bf16.vlgmr.msra.gmra.mxu1 %v5795_v5  ;;  %2442 = vmatpush1.bf16.msra.mxu0 %v4820_v15  ;;  %v4843_v5 = vld [vmem:[#allocation7 + $0x6cc] ss:$24 sps:$4 sm:$0xff]   ;;  %v4913_v15 = vld [vmem:[#allocation7 + $0x788] ss:$24 sps:$4 sm:$0xff]  }
 0x125   : > { %2485 = vmatpush1.bf16.msra.mxu1 %v4823_v16  ;;  %2443 = vmatprep.subr.bf16.mxu0 %v4828_v17  ;;  %v4918_v16 = vld [vmem:[#allocation7 + $0x164] ss:$24 sps:$4 sm:$0xff]  }
 0x126   : > { %2486 = vmatprep.subr.bf16.mxu1 %v4831_v18  ;;  %2473 = vmatprep.mubr.bf16.mxu0 %v5791_v51  ;;  %v4844_v51 = vld [vmem:[#allocation7 + $0x398] ss:$24 sps:$4 sm:$0xff]   ;;  %v4921_v17 = vld [vmem:[#allocation7 + $0x464] ss:$24 sps:$4 sm:$0xff]  }
 0x127   : > { %2516 = vmatprep.mubr.bf16.mxu1 %v5803_v36  ;;  %v4858_v36 = vld [vmem:[#allocation7 + $0x33c] ss:$24 sps:$4 sm:$0xff]   ;;  %v4916_v18 = vld [vmem:[#allocation7 + $0x160] ss:$24 sps:$4 sm:$0xff]  }
 0x128   : > { %2444 = vmatpush1.bf16.msra.mxu0 %v4826_v19  ;;  %v4919_v19 = vld [vmem:[#allocation7 + $0x460] ss:$24 sps:$4 sm:$0xff]  }
 0x129   : > { %2487 = vmatpush1.bf16.msra.mxu1 %v4829_v20  ;;  %2445 = vmatprep.subr.bf16.mxu0 %v4834_v21  ;;  %v4924_v20 = vld [vmem:[#allocation7 + $0x134] ss:$24 sps:$4 sm:$0xff]  }
 0x12a   : > { %2488 = vmatprep.subr.bf16.mxu1 %v4837_v22  ;;  %v4927_v21 = vld [vmem:[#allocation7 + $0x434] ss:$24 sps:$4 sm:$0xff]   ;;  %v4922_v22 = vld [vmem:[#allocation7 + $0x130] ss:$24 sps:$4 sm:$0xff]  }
 0x12c   : > { %2446 = vmatpush1.bf16.msra.mxu0 %v4832_v23  ;;  %v4925_v23 = vld [vmem:[#allocation7 + $0x430] ss:$24 sps:$4 sm:$0xff]  }
 0x12d   : > { %2489 = vmatpush1.bf16.msra.mxu1 %v4835_v24  ;;  %2447 = vmatprep.subr.bf16.mxu0 %v4840_v25  ;;  %v4930_v24 = vld [vmem:[#allocation7 + $0x104] ss:$24 sps:$4 sm:$0xff]  }
 0x12e   : > { %2490 = vmatprep.subr.bf16.mxu1 %v4843_v5  ;;  %v4933_v25 = vld [vmem:[#allocation7 + $0x404] ss:$24 sps:$4 sm:$0xff]  }
 0x12f   : > { %v5216_v5 = vld [vmem:[%s5766_s14 + $0x4] ss:$24 sps:$4 sm:$0xff]  }
 0x130   : > { %2448 = vmatpush1.bf16.msra.mxu0 %v4838_v26  ;;  %v5217_v26 = vld [vmem:[%s5766_s14 + $0xc] ss:$24 sps:$4 sm:$0xff]  }
 0x131   : > { %2491 = vmatpush1.bf16.msra.mxu1 %v4841_v27  ;;  %2449 = vmatprep.subr.bf16.mxu0 %v4846_v28  ;;  %v4928_v27 = vld [vmem:[#allocation7 + $0x100] ss:$24 sps:$4 sm:$0xff]  }
 0x132   : > { %2492 = vmatprep.subr.bf16.mxu1 %v4849_v29  ;;  %v4931_v28 = vld [vmem:[#allocation7 + $0x400] ss:$24 sps:$4 sm:$0xff]   ;;  %v4936_v29 = vld [vmem:[#allocation7 + $0xd4] ss:$24 sps:$4 sm:$0xff]  }
 0x134   : > { %2450 = vmatpush1.bf16.msra.mxu0 %v4844_v51  ;;  %v4937_v51 = vld [vmem:[#allocation7 + $0x3d0] ss:$24 sps:$4 sm:$0xff]  }
 0x135   : > { %2493 = vmatpush1.bf16.msra.mxu1 %v4847_v30  ;;  %2451 = vmatprep.subr.bf16.mxu0 %v4852_v31  ;;  %v4942_v30 = vld [vmem:[#allocation7 + $0xa4] ss:$24 sps:$4 sm:$0xff]  }
 0x136   : > { %2494 = vmatprep.subr.bf16.mxu1 %v4855_v32  ;;  %v4945_v31 = vld [vmem:[#allocation7 + $0x3a4] ss:$24 sps:$4 sm:$0xff]   ;;  %v4940_v32 = vld [vmem:[#allocation7 + $0xa0] ss:$24 sps:$4 sm:$0xff]  }
 0x138   : > { %2452 = vmatpush1.bf16.msra.mxu0 %v4850_v33  ;;  %v4943_v33 = vld [vmem:[#allocation7 + $0x3a0] ss:$24 sps:$4 sm:$0xff]  }
 0x139   : > { %2495 = vmatpush1.bf16.msra.mxu1 %v4853_v35  ;;  %2453 = vmatprep.subr.bf16.mxu0 %v4858_v36  ;;  %v4948_v35 = vld [vmem:[#allocation7 + $0x74] ss:$24 sps:$4 sm:$0xff]  }
 0x13a   : > { %2496 = vmatprep.subr.bf16.mxu1 %v4861_v37  ;;  %v4951_v36 = vld [vmem:[#allocation7 + $0x374] ss:$24 sps:$4 sm:$0xff]   ;;  %v4946_v37 = vld [vmem:[#allocation7 + $0x70] ss:$24 sps:$4 sm:$0xff]  }
 0x13c   : > { %2454 = vmatpush1.bf16.msra.mxu0 %v4856_v38  ;;  %v4949_v38 = vld [vmem:[#allocation7 + $0x370] ss:$24 sps:$4 sm:$0xff]  }
 0x13d   : > { %2497 = vmatpush1.bf16.msra.mxu1 %v4859_v39  ;;  %2455 = vmatprep.subr.bf16.mxu0 %v4864_v40  ;;  %v4954_v39 = vld [vmem:[#allocation7 + $0x44] ss:$24 sps:$4 sm:$0xff]  }
 0x13e   : > { %2498 = vmatprep.subr.bf16.mxu1 %v4867_v41  ;;  %v4957_v40 = vld [vmem:[#allocation7 + $0x344] ss:$24 sps:$4 sm:$0xff]   ;;  %v4952_v41 = vld [vmem:[#allocation7 + $0x40] ss:$24 sps:$4 sm:$0xff]  }
 0x140   : > { %2456 = vmatpush1.bf16.msra.mxu0 %v4862_v42  ;;  %v4955_v42 = vld [vmem:[#allocation7 + $0x340] ss:$24 sps:$4 sm:$0xff]  }
 0x141   : > { %2499 = vmatpush1.bf16.msra.mxu1 %v4865_v43  ;;  %2457 = vmatprep.subr.bf16.mxu0 %v4870_v44  ;;  %v4960_v43 = vld [vmem:[#allocation7 + $0x14] ss:$24 sps:$4 sm:$0xff]  }
 0x142   : > { %2500 = vmatprep.subr.bf16.mxu1 %v4873_v45  ;;  %v4963_v44 = vld [vmem:[#allocation7 + $0x314] ss:$24 sps:$4 sm:$0xff]   ;;  %v4958_v45 = vld [vmem:[#allocation7 + $0x10] ss:$24 sps:$4 sm:$0xff]  }
 0x144   : > { %2458 = vmatpush2.bf16.msra.mxu0 %v4868_v46  ;;  %v4961_v46 = vld [vmem:[#allocation7 + $0x310] ss:$24 sps:$4 sm:$0xff]  }
 0x145   : > { %2501 = vmatpush2.bf16.msra.mxu1 %v4871_v47  ;;  %2459 = vmatprep.subr.bf16.mxu0 %v4876_v48  ;;  %v4966_v47 = vld [vmem:[#allocation7 + $0x2e4] ss:$24 sps:$4 sm:$0xff]  }
 0x146   : > { %2502 = vmatprep.subr.bf16.mxu1 %v4879_v49  ;;  %v4969_v48 = vld [vmem:[#allocation7 + $0x5e4] ss:$24 sps:$4 sm:$0xff]   ;;  %v4964_v49 = vld [vmem:[#allocation7 + $0x2e0] ss:$24 sps:$4 sm:$0xff]  }
 0x148   : > { %2460 = vmatpush2.bf16.msra.mxu0 %v4874_v50  ;;  %v4967_v50 = vld [vmem:[#allocation7 + $0x5e0] ss:$24 sps:$4 sm:$0xff]  }
 0x149   : > { %2503 = vmatpush2.bf16.msra.mxu1 %v4877_v52  ;;  %2461 = vmatprep.subr.bf16.mxu0 %v4882_v53  ;;  %v4972_v52 = vld [vmem:[#allocation7 + $0x2b4] ss:$24 sps:$4 sm:$0xff]  }
 0x14a   : > { %2504 = vmatprep.subr.bf16.mxu1 %v4885_v54  ;;  %v4975_v53 = vld [vmem:[#allocation7 + $0x5b4] ss:$24 sps:$4 sm:$0xff]   ;;  %v4970_v54 = vld [vmem:[#allocation7 + $0x2b0] ss:$24 sps:$4 sm:$0xff]  }
 0x14c   : > { %2462 = vmatpush2.bf16.msra.mxu0 %v4880_v55  ;;  %v4973_v55 = vld [vmem:[#allocation7 + $0x5b0] ss:$24 sps:$4 sm:$0xff]  }
 0x14d   : > { %2505 = vmatpush2.bf16.msra.mxu1 %v4883_v56  ;;  %2463 = vmatprep.subr.bf16.mxu0 %v4888_v57  ;;  %v4978_v56 = vld [vmem:[#allocation7 + $0x284] ss:$24 sps:$4 sm:$0xff]  }
 0x14e   : > { %2506 = vmatprep.subr.bf16.mxu1 %v4891_v58  ;;  %v4981_v57 = vld [vmem:[#allocation7 + $0x584] ss:$24 sps:$4 sm:$0xff]   ;;  %v4976_v58 = vld [vmem:[#allocation7 + $0x280] ss:$24 sps:$4 sm:$0xff]  }
 0x150   : > { %2464 = vmatpush2.bf16.msra.mxu0 %v4886_v59  ;;  %v4979_v59 = vld [vmem:[#allocation7 + $0x580] ss:$24 sps:$4 sm:$0xff]  }
 0x151   : > { %2507 = vmatpush2.bf16.msra.mxu1 %v4889_v60  ;;  %2465 = vmatprep.subr.bf16.mxu0 %v4894_v61  ;;  %v4984_v60 = vld [vmem:[#allocation7 + $0x254] ss:$24 sps:$4 sm:$0xff]  }
 0x152   : > { %2508 = vmatprep.subr.bf16.mxu1 %v4897_v62  ;;  %v4987_v61 = vld [vmem:[#allocation7 + $0x554] ss:$24 sps:$4 sm:$0xff]   ;;  %v4982_v62 = vld [vmem:[#allocation7 + $0x250] ss:$24 sps:$4 sm:$0xff]  }
 0x154   : > { %2466 = vmatpush2.bf16.msra.mxu0 %v4892_v63  ;;  %v4985_v63 = vld [vmem:[#allocation7 + $0x550] ss:$24 sps:$4 sm:$0xff]  }
 0x155   : > { %2509 = vmatpush2.bf16.msra.mxu1 %v4895_v0  ;;  %2467 = vmatprep.subr.bf16.mxu0 %v4900_v1  ;;  %v4990_v0 = vld [vmem:[#allocation7 + $0x224] ss:$24 sps:$4 sm:$0xff]  }
 0x156   : > { %2510 = vmatprep.subr.bf16.mxu1 %v4903_v2  ;;  %v4993_v1 = vld [vmem:[#allocation7 + $0x524] ss:$24 sps:$4 sm:$0xff]   ;;  %v4988_v2 = vld [vmem:[#allocation7 + $0x220] ss:$24 sps:$4 sm:$0xff]  }
 0x158   : > { %2468 = vmatpush2.bf16.msra.mxu0 %v4898_v3  ;;  %v4991_v3 = vld [vmem:[#allocation7 + $0x520] ss:$24 sps:$4 sm:$0xff]  }
 0x159   : > { %2511 = vmatpush2.bf16.msra.mxu1 %v4901_v4  ;;  %2469 = vmatprep.subr.bf16.mxu0 %v4906_v6  ;;  %v4996_v4 = vld [vmem:[#allocation7 + $0x1f4] ss:$24 sps:$4 sm:$0xff]  }
 0x15a   : > { %2512 = vmatprep.subr.bf16.mxu1 %v4909_v7  ;;  %v4999_v6 = vld [vmem:[#allocation7 + $0x4f4] ss:$24 sps:$4 sm:$0xff]   ;;  %v4994_v7 = vld [vmem:[#allocation7 + $0x1f0] ss:$24 sps:$4 sm:$0xff]  }
 0x15c   : > { %2470 = vmatpush2.bf16.msra.mxu0 %v4904_v9  ;;  %v4997_v9 = vld [vmem:[#allocation7 + $0x4f0] ss:$24 sps:$4 sm:$0xff]  }
 0x15d   : > { %2513 = vmatpush2.bf16.msra.mxu1 %v4907_v10  ;;  %2471 = vmatprep.subr.bf16.mxu0 %v4912_v11  ;;  %v5002_v10 = vld [vmem:[#allocation7 + $0x1c4] ss:$24 sps:$4 sm:$0xff]  }
 0x15e   : > { %2514 = vmatprep.subr.bf16.mxu1 %v4915_v12  ;;  %v5005_v11 = vld [vmem:[#allocation7 + $0x4c4] ss:$24 sps:$4 sm:$0xff]   ;;  %v5000_v12 = vld [vmem:[#allocation7 + $0x1c0] ss:$24 sps:$4 sm:$0xff]  }
 0x160   : > { %2472 = vmatpush2.bf16.msra.mxu0 %v4910_v13  ;;  %v5003_v13 = vld [vmem:[#allocation7 + $0x4c0] ss:$24 sps:$4 sm:$0xff]  }
 0x161   : > { %2515 = vmatpush2.bf16.msra.mxu1 %v4913_v15  ;;  %2527 = vmatprep.subr.bf16.mxu0 %v4918_v16  ;;  %v5008_v15 = vld [vmem:[#allocation7 + $0x194] ss:$24 sps:$4 sm:$0xff]  }
 0x162   : > { %2570 = vmatprep.subr.bf16.mxu1 %v4921_v17  ;;  %v5011_v16 = vld [vmem:[#allocation7 + $0x494] ss:$24 sps:$4 sm:$0xff]   ;;  %v5006_v17 = vld [vmem:[#allocation7 + $0x190] ss:$24 sps:$4 sm:$0xff]  }
 0x163   : > { %2474 = vmatmul.mubr.bf16.vlgmr.msra.gmra.mxu0 %v5798_v8  ;;  %v4939_v8 = vld [vmem:[#allocation7 + $0x3d4] ss:$24 sps:$4 sm:$0xff]  }
 0x164   : > { %2517 = vmatmul.mubr.bf16.vlgmr.msra.gmra.mxu1 %v5811_v14  ;;  %2528 = vmatpush1.bf16.msra.mxu0 %v4916_v18  ;;  %v4934_v14 = vld [vmem:[#allocation7 + $0xd0] ss:$24 sps:$4 sm:$0xff]  }
 0x165   : > { %2571 = vmatpush1.bf16.msra.mxu1 %v4919_v19  ;;  %2529 = vmatprep.subr.bf16.mxu0 %v4924_v20  ;;  %v5009_v18 = vld [vmem:[#allocation7 + $0x490] ss:$24 sps:$4 sm:$0xff]   ;;  %v5014_v19 = vld [vmem:[#allocation7 + $0x764] ss:$24 sps:$4 sm:$0xff]   ;;  %v5017_v20 = vld [vmem:[#allocation5 + $0x154] ss:$24 sps:$4 sm:$0xff]  }
 0x166   : > { %2572 = vmatprep.subr.bf16.mxu1 %v4927_v21  ;;  %2559 = vmatprep.mubr.bf16.mxu0 %v5216_v5  ;;  %v5012_v21 = vld [vmem:[#allocation7 + $0x760] ss:$24 sps:$4 sm:$0xff]  }
 0x167   : > { %2602 = vmatprep.mubr.bf16.mxu1 %v5217_v26  ;;  %v5021_v5 = vld [vmem:[#allocation5 + $0x120] ss:$24 sps:$4 sm:$0xff]  }
 0x168   : > { %2530 = vmatpush1.bf16.msra.mxu0 %v4922_v22  ;;  %v5015_v22 = vld [vmem:[#allocation5 + $0x150] ss:$24 sps:$4 sm:$0xff]  }
 0x169   : > { %2573 = vmatpush1.bf16.msra.mxu1 %v4925_v23  ;;  %2531 = vmatprep.subr.bf16.mxu0 %v4930_v24  ;;  %v5020_v23 = vld [vmem:[#allocation7 + $0x734] ss:$24 sps:$4 sm:$0xff]   ;;  %v5023_v24 = vld [vmem:[#allocation5 + $0x124] ss:$24 sps:$4 sm:$0xff]   ;;  %v5218_v26 = vld [vmem:[%s5766_s14] ss:$24 sps:$4 sm:$0xff]  }
 0x16a   : > { %2574 = vmatprep.subr.bf16.mxu1 %v4933_v25  ;;  %v5018_v25 = vld [vmem:[#allocation7 + $0x730] ss:$24 sps:$4 sm:$0xff]  }
 0x16c   : > { %2532 = vmatpush1.bf16.msra.mxu0 %v4928_v27  ;;  %v5219_v27 = vld [vmem:[%s5766_s14 + $0x8] ss:$24 sps:$4 sm:$0xff]  }
 0x16d   : > { %2575 = vmatpush1.bf16.msra.mxu1 %v4931_v28  ;;  %2533 = vmatprep.subr.bf16.mxu0 %v4936_v29  ;;  %v5026_v28 = vld [vmem:[#allocation7 + $0x704] ss:$24 sps:$4 sm:$0xff]   ;;  %v5029_v29 = vld [vmem:[#allocation5 + $0xf4] ss:$24 sps:$4 sm:$0xff]  }
 0x16e   : > { %2576 = vmatprep.subr.bf16.mxu1 %v4939_v8  ;;  %v5024_v8 = vld [vmem:[#allocation7 + $0x700] ss:$24 sps:$4 sm:$0xff]  }
 0x170   : > { %2534 = vmatpush1.bf16.msra.mxu0 %v4934_v14  ;;  %v5027_v14 = vld [vmem:[#allocation5 + $0xf0] ss:$24 sps:$4 sm:$0xff]  }
 0x171   : > { %2577 = vmatpush1.bf16.msra.mxu1 %v4937_v51  ;;  %2535 = vmatprep.subr.bf16.mxu0 %v4942_v30  ;;  %v5220_v51 = vld [vmem:[%s5766_s14 + $0x14] ss:$24 sps:$4 sm:$0xff]  }
 0x172   : > { %2578 = vmatprep.subr.bf16.mxu1 %v4945_v31  ;;  %v5032_v30 = vld [vmem:[#allocation7 + $0x6d4] ss:$24 sps:$4 sm:$0xff]   ;;  %v5035_v31 = vld [vmem:[#allocation5 + $0xc4] ss:$24 sps:$4 sm:$0xff]  }
 0x174   : > { %2536 = vmatpush1.bf16.msra.mxu0 %v4940_v32  ;;  %v5030_v32 = vld [vmem:[#allocation7 + $0x6d0] ss:$24 sps:$4 sm:$0xff]  }
 0x175   : > { %2579 = vmatpush1.bf16.msra.mxu1 %v4943_v33  ;;  %2537 = vmatprep.subr.bf16.mxu0 %v4948_v35  ;;  %v5033_v33 = vld [vmem:[#allocation5 + $0xc0] ss:$24 sps:$4 sm:$0xff]   ;;  %v5038_v35 = vld [vmem:[#allocation7 + $0x6a4] ss:$24 sps:$4 sm:$0xff]  }
 0x176   : > { %2580 = vmatprep.subr.bf16.mxu1 %v4951_v36  ;;  %v5041_v36 = vld [vmem:[#allocation5 + $0x94] ss:$24 sps:$4 sm:$0xff]  }
 0x178   : > { %2538 = vmatpush1.bf16.msra.mxu0 %v4946_v37  ;;  %v5036_v37 = vld [vmem:[#allocation7 + $0x6a0] ss:$24 sps:$4 sm:$0xff]  }
 0x179   : > { %2581 = vmatpush1.bf16.msra.mxu1 %v4949_v38  ;;  %2539 = vmatprep.subr.bf16.mxu0 %v4954_v39  ;;  %v5039_v38 = vld [vmem:[#allocation5 + $0x90] ss:$24 sps:$4 sm:$0xff]   ;;  %v5044_v39 = vld [vmem:[#allocation7 + $0x674] ss:$24 sps:$4 sm:$0xff]  }
 0x17a   : > { %2582 = vmatprep.subr.bf16.mxu1 %v4957_v40  ;;  %v5047_v40 = vld [vmem:[#allocation5 + $0x64] ss:$24 sps:$4 sm:$0xff]  }
 0x17c   : > { %2540 = vmatpush1.bf16.msra.mxu0 %v4952_v41  ;;  %v5042_v41 = vld [vmem:[#allocation7 + $0x670] ss:$24 sps:$4 sm:$0xff]  }
 0x17d   : > { %2583 = vmatpush1.bf16.msra.mxu1 %v4955_v42  ;;  %2541 = vmatprep.subr.bf16.mxu0 %v4960_v43  ;;  %v5045_v42 = vld [vmem:[#allocation5 + $0x60] ss:$24 sps:$4 sm:$0xff]   ;;  %v2674_v43 = vpop.permute.xlu0 %2673 }
 0x17e   : > { %2584 = vmatprep.subr.bf16.mxu1 %v4963_v44  ;;  %v5050_v44 = vld [vmem:[#allocation7 + $0x644] ss:$24 sps:$4 sm:$0xff]  }
 0x180   : > { %2542 = vmatpush1.bf16.msra.mxu0 %v4958_v45  ;;  %v5053_v45 = vld [vmem:[#allocation5 + $0x34] ss:$24 sps:$4 sm:$0xff]  }
 0x181   : > { %2585 = vmatpush1.bf16.msra.mxu1 %v4961_v46  ;;  %2543 = vmatprep.subr.bf16.mxu0 %v4966_v47  ;;  %v769_v46 = vlaneseq  ;;  %v5048_v47 = vld [vmem:[#allocation7 + $0x640] ss:$24 sps:$4 sm:$0xff]  }
 0x182   : > { %2586 = vmatprep.subr.bf16.mxu1 %v4969_v48  ;;  %v5051_v48 = vld [vmem:[#allocation5 + $0x30] ss:$24 sps:$4 sm:$0xff]  }
 0x184   : > { %2544 = vmatpush2.bf16.msra.mxu0 %v4964_v49  ;;  %v2669_v49 = vand.u32 127, %v769_v46 }
 0x185   : > { %2587 = vmatpush2.bf16.msra.mxu1 %v4967_v50  ;;  %2545 = vmatprep.subr.bf16.mxu0 %v4972_v52  ;;  %v5056_v50 = vld [vmem:[#allocation7 + $0x614] ss:$24 sps:$4 sm:$0xff]   ;;  %v5059_v52 = vld [vmem:[#allocation5 + $0x4] ss:$24 sps:$4 sm:$0xff]  }
 0x186   : > { %2588 = vmatprep.subr.bf16.mxu1 %v4975_v53  ;;  %v2677_v53 = vpop.permute.xlu0 %2676  ;;  %vm2678_vm0 = vcmp.eq.s32.totalorder %v2669_v49, %v2674_v43  ;;  %v5133_v43 = vld [vmem:[#allocation10 + $0x38] sm:$0xff]  }
 0x187   : > { %vm2679_vm1 = vcmp.eq.s32.totalorder %v2669_v49, %v2677_v53  ;;  %v5137_v49 = vld [vmem:[#allocation10 + $0x30] sm:$0xff]   ;;  %v5142_v53 = vld [vmem:[#allocation10 + $0xe8] sm:$0xff]  }
 0x188   : > { %2546 = vmatpush2.bf16.msra.mxu0 %v4970_v54  ;;  %v5054_v54 = vld [vmem:[#allocation7 + $0x610] ss:$24 sps:$4 sm:$0xff]   ;;  %vm5826_vm2 = vmpackc.low %vm2679_vm1, %vm2678_vm0 }
 0x189   : > { %2589 = vmatpush2.bf16.msra.mxu1 %v4973_v55  ;;  %2547 = vmatprep.subr.bf16.mxu0 %v4978_v56  ;;  %v5057_v55 = vld [vmem:[#allocation5] ss:$24 sps:$4 sm:$0xff]   ;;  %v5062_v56 = vld [vmem:[#allocation7 + $0x8e4] ss:$24 sps:$4 sm:$0xff]  }
 0x18a   : > { %2590 = vmatprep.subr.bf16.mxu1 %v4981_v57  ;;  %v5065_v57 = vld [vmem:[#allocation5 + $0x15c] ss:$24 sps:$4 sm:$0xff]  }
 0x18c   : > { %2548 = vmatpush2.bf16.msra.mxu0 %v4976_v58  ;;  %v5145_v58 = vld [vmem:[#allocation10 + $0x20] sm:$0xff]  }
 0x18d   : > { %2591 = vmatpush2.bf16.msra.mxu1 %v4979_v59  ;;  %2549 = vmatprep.subr.bf16.mxu0 %v4984_v60  ;;  %v5060_v59 = vld [vmem:[#allocation7 + $0x8e0] ss:$24 sps:$4 sm:$0xff]  }
 0x18e   : > { %2592 = vmatprep.subr.bf16.mxu1 %v4987_v61  ;;  %v5063_v60 = vld [vmem:[#allocation5 + $0x158] ss:$24 sps:$4 sm:$0xff]   ;;  %v5068_v61 = vld [vmem:[#allocation7 + $0x8b4] ss:$24 sps:$4 sm:$0xff]  }
 0x190   : > { %2550 = vmatpush2.bf16.msra.mxu0 %v4982_v62  ;;  %v5071_v62 = vld [vmem:[#allocation5 + $0x12c] ss:$24 sps:$4 sm:$0xff]  }
 0x191   : > { %2593 = vmatpush2.bf16.msra.mxu1 %v4985_v63  ;;  %2551 = vmatprep.subr.bf16.mxu0 %v4990_v0  ;;  %v5527_v63 = vmov 1.0|1.0   ;;  %v5066_v0 = vld [vmem:[#allocation7 + $0x8b0] ss:$24 sps:$4 sm:$0xff]  }
 0x192   : > { %2594 = vmatprep.subr.bf16.mxu1 %v4993_v1  ;;  %v5069_v1 = vld [vmem:[#allocation5 + $0x128] ss:$24 sps:$4 sm:$0xff]  }
 0x194   : > { %2552 = vmatpush2.bf16.msra.mxu0 %v4988_v2  ;;  %v5074_v2 = vld [vmem:[#allocation7 + $0x884] ss:$24 sps:$4 sm:$0xff]  }
 0x195   : > { %2595 = vmatpush2.bf16.msra.mxu1 %v4991_v3  ;;  %2553 = vmatprep.subr.bf16.mxu0 %v4996_v4  ;;  %v5077_v3 = vld [vmem:[#allocation5 + $0xfc] ss:$24 sps:$4 sm:$0xff]   ;;  %v5072_v4 = vld [vmem:[#allocation7 + $0x880] ss:$24 sps:$4 sm:$0xff]  }
 0x196   : > { %2596 = vmatprep.subr.bf16.mxu1 %v4999_v6  ;;  %v5075_v6 = vld [vmem:[#allocation5 + $0xf8] ss:$24 sps:$4 sm:$0xff]  }
 0x198   : > { %2554 = vmatpush2.bf16.msra.mxu0 %v4994_v7  ;;  %v5080_v7 = vld [vmem:[#allocation7 + $0x854] ss:$24 sps:$4 sm:$0xff]  }
 0x199   : > { %2597 = vmatpush2.bf16.msra.mxu1 %v4997_v9  ;;  %2555 = vmatprep.subr.bf16.mxu0 %v5002_v10  ;;  %v5083_v9 = vld [vmem:[#allocation5 + $0xcc] ss:$24 sps:$4 sm:$0xff]   ;;  %v5078_v10 = vld [vmem:[#allocation7 + $0x850] ss:$24 sps:$4 sm:$0xff]  }
 0x19a   : > { %2598 = vmatprep.subr.bf16.mxu1 %v5005_v11  ;;  %v5081_v11 = vld [vmem:[#allocation5 + $0xc8] ss:$24 sps:$4 sm:$0xff]  }
 0x19c   : > { %2556 = vmatpush2.bf16.msra.mxu0 %v5000_v12  ;;  %v5086_v12 = vld [vmem:[#allocation7 + $0x824] ss:$24 sps:$4 sm:$0xff]  }
 0x19d   : > { %2599 = vmatpush2.bf16.msra.mxu1 %v5003_v13  ;;  %2557 = vmatprep.subr.bf16.mxu0 %v5008_v15  ;;  %v5089_v13 = vld [vmem:[#allocation5 + $0x9c] ss:$24 sps:$4 sm:$0xff]   ;;  %v5084_v15 = vld [vmem:[#allocation7 + $0x820] ss:$24 sps:$4 sm:$0xff]  }
 0x19e   : > { %2600 = vmatprep.subr.bf16.mxu1 %v5011_v16  ;;  %v5087_v16 = vld [vmem:[#allocation5 + $0x98] ss:$24 sps:$4 sm:$0xff]  }
 0x1a0   : > { %2558 = vmatpush2.bf16.msra.mxu0 %v5006_v17  ;;  %v5092_v17 = vld [vmem:[#allocation7 + $0x7f4] ss:$24 sps:$4 sm:$0xff]  }
 0x1a1   : > { %2601 = vmatpush2.bf16.msra.mxu1 %v5009_v18  ;;  %2613 = vmatprep.subr.bf16.mxu0 %v5014_v19  ;;  %v5095_v18 = vld [vmem:[#allocation5 + $0x6c] ss:$24 sps:$4 sm:$0xff]   ;;  %v5090_v19 = vld [vmem:[#allocation7 + $0x7f0] ss:$24 sps:$4 sm:$0xff]  }
 0x1a2   : > { %2973 = vmatprep.subr.bf16.mxu1 %v5017_v20  ;;  %v5093_v20 = vld [vmem:[#allocation5 + $0x68] ss:$24 sps:$4 sm:$0xff]  }
 0x1a3   : > { %2560 = vmatmul.mubr.bf16.vlgmr.msra.gmra.mxu0 %v5218_v26  ;;  %v5102_v26 = vld [vmem:[#allocation7 + $0x790] ss:$24 sps:$4 sm:$0xff]  }
 0x1a4   : > { %2603 = vmatmul.mubr.bf16.vlgmr.msra.gmra.mxu1 %v5219_v27  ;;  %2614 = vmatpush1.bf16.msra.mxu0 %v5012_v21  ;;  %v5098_v21 = vld [vmem:[#allocation7 + $0x7c4] ss:$24 sps:$4 sm:$0xff]   ;;  %v5105_v27 = vld [vmem:[#allocation5 + $0x8] ss:$24 sps:$4 sm:$0xff]  }
 0x1a5   : > { %2974 = vmatpush1.bf16.msra.mxu1 %v5015_v22  ;;  %2615 = vmatprep.subr.bf16.mxu0 %v5020_v23  ;;  %v5101_v22 = vld [vmem:[#allocation5 + $0x3c] ss:$24 sps:$4 sm:$0xff]   ;;  %v5096_v23 = vld [vmem:[#allocation7 + $0x7c0] ss:$24 sps:$4 sm:$0xff]  }
 0x1a6   : > { %2975 = vmatprep.subr.bf16.mxu1 %v5023_v24  ;;  %3005 = vmatprep.mubr.bf16.mxu1 %v5526_v34  ;;  %v5099_v24 = vld [vmem:[#allocation5 + $0x38] ss:$24 sps:$4 sm:$0xff]  }
 0x1a7   : > { %2645 = vmatprep.mubr.bf16.mxu0 %v5220_v51  ;;  %v5111_v51 = vld [vmem:[#allocation5 + $0x130] ss:$24 sps:$4 sm:$0xff]  }
 0x1a8   : > { %2616 = vmatpush1.bf16.msra.mxu0 %v5018_v25  ;;  %v5104_v25 = vld [vmem:[#allocation7 + $0x794] ss:$24 sps:$4 sm:$0xff]  }
 0x1a9   : > { %2976 = vmatpush1.bf16.msra.mxu1 %v5021_v5  ;;  %2617 = vmatprep.subr.bf16.mxu0 %v5026_v28  ;;  %v5107_v5 = vld [vmem:[#allocation5 + $0xc] ss:$24 sps:$4 sm:$0xff]  }
 0x1aa   : > { %2977 = vmatprep.subr.bf16.mxu1 %v5029_v29  ;;  %v5110_v28 = vld [vmem:[#allocation5 + $0x164] ss:$24 sps:$4 sm:$0xff]   ;;  %v5108_v29 = vld [vmem:[#allocation5 + $0x160] ss:$24 sps:$4 sm:$0xff]  }
 0x1ac   : > { %2618 = vmatpush1.bf16.msra.mxu0 %v5024_v8  ;;  %v5113_v8 = vld [vmem:[#allocation5 + $0x134] ss:$24 sps:$4 sm:$0xff]  }
 0x1ad   : > { %2978 = vmatpush1.bf16.msra.mxu1 %v5027_v14  ;;  %2619 = vmatprep.subr.bf16.mxu0 %v5032_v30  ;;  %v5221_v14 = vld [vmem:[%s5766_s14 + $0x10] ss:$24 sps:$4 sm:$0xff]   ;;  %v5116_v30 = vld [vmem:[#allocation5 + $0x104] ss:$24 sps:$4 sm:$0xff]   ;;  %s5432_s14 = scalar_lea.vmem %s5921_s22, 256 }
 0x1ae   : > { %2979 = vmatprep.subr.bf16.mxu1 %v5035_v31  ;;  %v5114_v31 = vld [vmem:[#allocation5 + $0x100] ss:$24 sps:$4 sm:$0xff]   ;;  %p5433_p5 = scmp.ne.s32.totalorder %s5921_s22, %s5432_s14  ;;  %p5440_p13 = scmp.lt.s32.totalorder %s5438_s24, %s5432_s14 }
 0x1b0   : > { %2620 = vmatpush1.bf16.msra.mxu0 %v5030_v32  ;;  %v5119_v32 = vld [vmem:[#allocation5 + $0xd4] ss:$24 sps:$4 sm:$0xff]   ;;  %p5434_p7 = pnand %p5433_p5, %p6013_p1  ;;  %p5441_p6 = por %p5440_p13, %p5439_p3 }
 0x1b1   : > { %2980 = vmatpush1.bf16.msra.mxu1 %v5033_v33  ;;  %2621 = vmatprep.subr.bf16.mxu0 %v5038_v35  ;;  %v5117_v33 = vld [vmem:[#allocation5 + $0xd0] ss:$24 sps:$4 sm:$0xff]   ;;  %v5122_v35 = vld [vmem:[#allocation5 + $0xa4] ss:$24 sps:$4 sm:$0xff]  }
 0x1b2   : > { %2981 = vmatprep.subr.bf16.mxu1 %v5041_v36  ;;  %v5120_v36 = vld [vmem:[#allocation5 + $0xa0] ss:$24 sps:$4 sm:$0xff]   ;;  %p5435_p8 = pneg %p5434_p7 }
 0x1b4   : > { %2622 = vmatpush1.bf16.msra.mxu0 %v5036_v37  ;;  %v5125_v37 = vld [vmem:[#allocation5 + $0x74] ss:$24 sps:$4 sm:$0xff]   ;;  %p5442_p10 = pnand %p5441_p6, %p5435_p8 }
 0x1b5   : > { %2982 = vmatpush1.bf16.msra.mxu1 %v5039_v38  ;;  %2623 = vmatprep.subr.bf16.mxu0 %v5044_v39  ;;  %v5123_v38 = vld [vmem:[#allocation5 + $0x70] ss:$24 sps:$4 sm:$0xff]   ;;  %v5128_v39 = vld [vmem:[#allocation5 + $0x44] ss:$24 sps:$4 sm:$0xff]  }
 0x1b6   : > { %2983 = vmatprep.subr.bf16.mxu1 %v5047_v40  ;;  %v5131_v40 = vld [vmem:[#allocation5 + $0x14] ss:$24 sps:$4 sm:$0xff]  }
 0x1b8   : > { %2624 = vmatpush1.bf16.msra.mxu0 %v5042_v41  ;;  %v5129_v41 = vld [vmem:[#allocation5 + $0x10] ss:$24 sps:$4 sm:$0xff]  }
 0x1b9   : > { %2984 = vmatpush1.bf16.msra.mxu1 %v5045_v42  ;;  %2625 = vmatprep.subr.bf16.mxu0 %v5050_v44  ;;  %v5132_v42 = vld [vmem:[#allocation10 + $0x78] sm:$0xff]  }
 0x1ba   : > { %2985 = vmatprep.subr.bf16.mxu1 %v5053_v45  ;;  %v5134_v44 = vld [vmem:[#allocation10 + $0xf8] sm:$0xff]  }
 0x1bb   : > { %v5135_v45 = vld [vmem:[#allocation10 + $0xb8] sm:$0xff]  }
 0x1bc   : > { %2626 = vmatpush1.bf16.msra.mxu0 %v5048_v47  ;;  %v5136_v47 = vld [vmem:[#allocation10 + $0x70] sm:$0xff]  }
 0x1bd   : > { %2986 = vmatpush1.bf16.msra.mxu1 %v5051_v48  ;;  %2627 = vmatprep.subr.bf16.mxu0 %v5056_v50  ;;  %v5138_v48 = vld [vmem:[#allocation10 + $0xf0] sm:$0xff]  }
 0x1be   : > { %2987 = vmatprep.subr.bf16.mxu1 %v5059_v52  ;;  %v5139_v50 = vld [vmem:[#allocation10 + $0xb0] sm:$0xff]   ;;  %v5140_v52 = vld [vmem:[#allocation10 + $0x68] sm:$0xff]  }
 0x1c0   : > { %2628 = vmatpush1.bf16.msra.mxu0 %v5054_v54  ;;  %v5141_v54 = vld [vmem:[#allocation10 + $0x28] sm:$0xff]  }
 0x1c1   : > { %2988 = vmatpush1.bf16.msra.mxu1 %v5057_v55  ;;  %2629 = vmatprep.subr.bf16.mxu0 %v5062_v56  ;;  %v5143_v55 = vld [vmem:[#allocation10 + $0xa8] sm:$0xff]   ;;  %v5144_v56 = vld [vmem:[#allocation10 + $0x60] sm:$0xff]  }
 0x1c2   : > { %3016 = vmatprep.subr.bf16.mxu1 %v5065_v57  ;;  %v5146_v57 = vld [vmem:[#allocation10 + $0xe0] sm:$0xff]  }
 0x1c4   : > { %4324 = vmatmul.mubr.msk.bf16.vlgmr.msra.gmra.mxu1 %vm5826_vm2, %v5527_v63  ;;  %2630 = vmatpush2.bf16.msra.mxu0 %v5060_v59  ;;  %v5147_v59 = vld [vmem:[#allocation10 + $0xa0] sm:$0xff]  }
 0x1c5   : > { %3017 = vmatpush1.bf16.msra.mxu1 %v5063_v60  ;;  %2631 = vmatprep.subr.bf16.mxu0 %v5068_v61  ;;  %v5148_v60 = vld [vmem:[#allocation10 + $0x58] sm:$0xff]  }
 0x1c6   : > { %3018 = vmatprep.subr.bf16.mxu1 %v5071_v62  ;;  %3048 = vmatprep.mubr.bf16.mxu1 %v5526_v34  ;;  %v5150_v61 = vld [vmem:[#allocation10 + $0xd8] sm:$0xff]  }
 0x1c7   : > { %v5149_v62 = vld [vmem:[#allocation10 + $0x18] sm:$0xff]  }
 0x1c8   : > { %2632 = vmatpush2.bf16.msra.mxu0 %v5066_v0  ;;  %v5152_v0 = vld [vmem:[#allocation10 + $0x50] sm:$0xff]  }
 0x1c9   : > { %3019 = vmatpush1.bf16.msra.mxu1 %v5069_v1  ;;  %2633 = vmatprep.subr.bf16.mxu0 %v5074_v2  ;;  %v5154_v1 = vld [vmem:[#allocation10 + $0xd0] sm:$0xff]  }
 0x1ca   : > { %3020 = vmatprep.subr.bf16.mxu1 %v5077_v3  ;;  %v5153_v2 = vld [vmem:[#allocation10 + $0x10] sm:$0xff]   ;;  %v2346_v3 = vpop.f32.mrf.mxu1 }
 0x1cc   : > { %2634 = vmatpush2.bf16.msra.mxu0 %v5072_v4  ;;  %v2303_v4 = vpop.f32.mrf.mxu0 }
 0x1cd   : > { %3021 = vmatpush1.bf16.msra.mxu1 %v5075_v6  ;;  %2635 = vmatprep.subr.bf16.mxu0 %v5080_v7  ;;  %v2348_v6 = vpop.f32.mrf.mxu1 }
 0x1ce   : > { %3022 = vmatprep.subr.bf16.mxu1 %v5083_v9  ;;  %v2305_v7 = vpop.f32.mrf.mxu0 }
 0x1cf   : > { %v2350_v9 = vpop.f32.mrf.mxu1 }
 0x1d0   : > { %2636 = vmatpush2.bf16.msra.mxu0 %v5078_v10  ;;  %v2307_v10 = vpop.f32.mrf.mxu0 }
 0x1d1   : > { %3023 = vmatpush1.bf16.msra.mxu1 %v5081_v11  ;;  %2637 = vmatprep.subr.bf16.mxu0 %v5086_v12  ;;  %v2352_v11 = vpop.f32.mrf.mxu1 }
 0x1d2   : > { %3024 = vmatprep.subr.bf16.mxu1 %v5089_v13  ;;  %v2309_v12 = vpop.f32.mrf.mxu0 }
 0x1d4   : > { %2638 = vmatpush2.bf16.msra.mxu0 %v5084_v15 }
 0x1d5   : > { %3025 = vmatpush1.bf16.msra.mxu1 %v5087_v16  ;;  %2639 = vmatprep.subr.bf16.mxu0 %v5092_v17 }
 0x1d6   : > { %3026 = vmatprep.subr.bf16.mxu1 %v5095_v18 }
 0x1d8   : > { %2640 = vmatpush2.bf16.msra.mxu0 %v5090_v19 }
 0x1d9   : > { %3027 = vmatpush1.bf16.msra.mxu1 %v5093_v20  ;;  %2641 = vmatprep.subr.bf16.mxu0 %v5098_v21 }
 0x1da   : > { %3028 = vmatprep.subr.bf16.mxu1 %v5101_v22 }
 0x1dc   : > { %2642 = vmatpush2.bf16.msra.mxu0 %v5096_v23 }
 0x1dd   : > { %3029 = vmatpush1.bf16.msra.mxu1 %v5099_v24  ;;  %2643 = vmatprep.subr.bf16.mxu0 %v5104_v25 }
 0x1de   : > { %3030 = vmatprep.subr.bf16.mxu1 %v5107_v5 }
 0x1e0   : > { %2644 = vmatpush2.bf16.msra.mxu0 %v5102_v26 }
 0x1e1   : > { %3031 = vmatpush1.bf16.msra.mxu1 %v5105_v27  ;;  %3059 = vmatprep.subr.bf16.mxu0 %v5110_v28  ;;  %v770_v27 = vshrl.u32 %v769_v46, 7 }
 0x1e2   : > { %4393 = vmatprep.subr.bf16.mxu1 %v5132_v42 }
 0x1e3   : > { %2646 = vmatmul.mubr.bf16.vlgmr.msra.gmra.mxu0 %v5221_v14  ;;  %v2389_v15 = vpop.f32.mrf.mxu0  ;;  %v775_v14 = vsub.s32 1, %v770_v27 }
 0x1e4   : > { %4326 = vmatmul.mubr.msk.bf16.vlgmr.msra.gmra.mxu1 %vm5826_vm2, %v5527_v63  ;;  %3060 = vmatpush1.bf16.msra.mxu0 %v5108_v29  ;;  %v2432_v13 = vpop.f32.mrf.mxu1 }
 0x1e5   : > { %3091 = vmatprep.mubr.bf16.mxu0 %v5526_v34  ;;  %3061 = vmatprep.subr.bf16.mxu0 %v5113_v8  ;;  %v5126_v34 = vld [vmem:[#allocation5 + $0x40] ss:$24 sps:$4 sm:$0xff]   ;;  %v2391_v17 = vpop.f32.mrf.mxu0 }
 0x1e6   : > { %4394 = vmatpush3.bf16.msra.mxu1 %v5133_v43  ;;  %v2434_v16 = vpop.f32.mrf.mxu1 }
 0x1e7   : > { %4395 = vmatprep.subr.bf16.mxu1 %v5136_v47  ;;  %v2393_v19 = vpop.f32.mrf.mxu0 }
 0x1e8   : > { %3062 = vmatpush1.bf16.msra.mxu0 %v5111_v51  ;;  %v2436_v18 = vpop.f32.mrf.mxu1  ;;  %v767_v51 = vld [vmem:[#allocation8] sm:$0x3f] }
 0x1e9   : > { %3063 = vmatprep.subr.bf16.mxu0 %v5116_v30  ;;  %v2395_v21 = vpop.f32.mrf.mxu0  ;;  %v771_v30 = vsub.s32 0, %v770_v27 }
 0x1ea   : > { %4396 = vmatpush3.bf16.msra.mxu1 %v5137_v49  ;;  %v2438_v20 = vpop.f32.mrf.mxu1 }
 0x1eb   : > { %4397 = vmatprep.subr.bf16.mxu1 %v5140_v52  ;;  %v791_v52 = vsub.s32 5, %v770_v27 }
 0x1ec   : > { %3064 = vmatpush1.bf16.msra.mxu0 %v5114_v31 }
 0x1ed   : > { %3065 = vmatprep.subr.bf16.mxu0 %v5119_v32  ;;  %v779_v32 = vsub.s32 2, %v770_v27 }
 0x1ee   : > { %4398 = vmatpush3.bf16.msra.mxu1 %v5141_v54 }
 0x1ef   : > { %4399 = vmatprep.subr.bf16.mxu1 %v5144_v56 }
 0x1f0   : > { %3066 = vmatpush1.bf16.msra.mxu0 %v5117_v33 }
 0x1f1   : > { %3067 = vmatprep.subr.bf16.mxu0 %v5122_v35  ;;  %v776_v35 = vrot.slane %v767_v51, %v775_v14 }
 0x1f2   : > { %4400 = vmatpush3.bf16.msra.mxu1 %v5145_v58 }
 0x1f3   : > { %4401 = vmatprep.subr.bf16.mxu1 %v5148_v60  ;;  %v2310_v49 = vadd.f32 %v2309_v12, %v776_v35 }
 0x1f4   : > { %3068 = vmatpush1.bf16.msra.mxu0 %v5120_v36  ;;  %v772_v36 = vrot.slane %v767_v51, %v771_v30 }
 0x1f5   : > { %3069 = vmatprep.subr.bf16.mxu0 %v5125_v37  ;;  %v783_v37 = vsub.s32 3, %v770_v27 }
 0x1f6   : > { %4402 = vmatpush3.bf16.msra.mxu1 %v5149_v62 }
 0x1f7   : > { %4403 = vmatprep.subr.bf16.mxu1 %v5152_v0  ;;  %v784_v42 = vrot.slane %v767_v51, %v783_v37  ;;  %v2353_v0 = vadd.f32 %v2352_v11, %v2310_v49 }
 0x1f8   : > { %3070 = vmatpush1.bf16.msra.mxu0 %v5123_v38 }
 0x1f9   : > { %3071 = vmatprep.subr.bf16.mxu0 %v5128_v39  ;;  %v780_v39 = vrot.slane %v767_v51, %v779_v32  ;;  %v2435_v54 = vadd.f32 %v2434_v16, %v784_v42 }
 0x1fa   : > { %4404 = vmatpush3.bf16.msra.mxu1 %v5153_v2 }
 0x1fb   : > { %v2433_v46 = vadd.f32 %v2432_v13, %v780_v39  ;;  %v2437_v58 = vadd.f32 %v2436_v18, %v780_v39 }
 0x1fc   : > { %3072 = vmatpush1.bf16.msra.mxu0 %v5126_v34 }
 0x1fd   : > { %3073 = vmatprep.subr.bf16.mxu0 %v5131_v40  ;;  %v2306_v40 = vadd.f32 %v2305_v7, %v776_v35  ;;  %v2439_v7 = vadd.f32 %v2438_v20, %v784_v42 }
 0x200   : > { %3074 = vmatpush1.bf16.msra.mxu0 %v5129_v41  ;;  %v2304_v41 = vadd.f32 %v2303_v4, %v772_v36  ;;  %v792_v4 = vrot.slane %v767_v51, %v791_v52 }
 0x201   : > { %4415 = vmatprep.subr.bf16.mxu0 %v5134_v44  ;;  %v787_v44 = vsub.s32 4, %v770_v27 }
 0x203   : > { %4328 = vmatmul.mubr.msk.bf16.vlgmr.msra.gmra.mxu0 %vm5826_vm2, %v5527_v63  ;;  %v5151_v63 = vld [vmem:[#allocation10 + $0x98] sm:$0xff]  }
 0x204   : > { %4416 = vmatpush3.bf16.msra.mxu0 %v5135_v45  ;;  %v2308_v45 = vadd.f32 %v2307_v10, %v772_v36 }
 0x205   : > { %4417 = vmatprep.subr.bf16.mxu0 %v5138_v48  ;;  %v2349_v48 = vadd.f32 %v2348_v6, %v2306_v40 }
 0x206   : > { %v2351_v60 = vadd.f32 %v2350_v9, %v2308_v45 }
 0x208   : > { %4418 = vmatpush3.bf16.msra.mxu0 %v5139_v50  ;;  %v2394_v6 = vadd.f32 %v2393_v19, %v2351_v60 }
 0x209   : > { %4419 = vmatprep.subr.bf16.mxu0 %v5142_v53  ;;  %v2347_v53 = vadd.f32 %v2346_v3, %v2304_v41  ;;  %v2396_v3 = vadd.f32 %v2395_v21, %v2353_v0 }
 0x20c   : > { %4420 = vmatpush3.bf16.msra.mxu0 %v5143_v55 }
 0x20d   : > { %4421 = vmatprep.subr.bf16.mxu0 %v5146_v57  ;;  %v2392_v57 = vadd.f32 %v2391_v17, %v2349_v48 }
 0x20f   : > { %5188 = vtanh.f32 %v2392_v57 }
 0x210   : > { %4422 = vmatpush3.bf16.msra.mxu0 %v5147_v59  ;;  %v788_v59 = vrot.slane %v767_v51, %v787_v44 }
 0x211   : > { %4423 = vmatprep.subr.bf16.mxu0 %v5150_v61  ;;  %v2390_v61 = vadd.f32 %v2389_v15, %v2347_v53 }
 0x213   : > { %5190 = vtanh.f32 %v2390_v61 }
 0x214   : > { %4424 = vmatpush3.bf16.msra.mxu0 %v5151_v63 }
 0x215   : > { %4425 = vmatprep.subr.bf16.mxu0 %v5154_v1 }
 0x21c   : > { %v5853_v30 = vpop.eup %5188 }
 0x223   : > { %v2475_v23 = vpop.f32.mrf.mxu0 }
 0x224   : > { %v2518_v22 = vpop.f32.mrf.mxu1  ;;  %v2476_v50 = vadd.f32 %v2475_v23, %v2433_v46 }
 0x225   : > { %v2477_v25 = vpop.f32.mrf.mxu0 }
 0x226   : > { %v2520_v24 = vpop.f32.mrf.mxu1  ;;  %v2478_v62 = vadd.f32 %v2477_v25, %v2435_v54  ;;  %v2519_v1 = vadd.f32 %v2518_v22, %v2476_v50 }
 0x227   : > { %v2479_v26 = vpop.f32.mrf.mxu0 }
 0x228   : > { %v2522_v5 = vpop.f32.mrf.mxu1  ;;  %v2480_v2 = vadd.f32 %v2479_v26, %v2437_v58  ;;  %v2521_v13 = vadd.f32 %v2520_v24, %v2478_v62  ;;  %5192 = vtanh.f32 %v2519_v1 }
 0x229   : > { %v2481_v29 = vpop.f32.mrf.mxu0  ;;  %5194 = vtanh.f32 %v2394_v6 }
 0x22a   : > { %v2524_v28 = vpop.f32.mrf.mxu1  ;;  %v2482_v16 = vadd.f32 %v2481_v29, %v2439_v7  ;;  %v2523_v9 = vadd.f32 %v2522_v5, %v2480_v2  ;;  %5196 = vtanh.f32 %v2396_v3 }
 0x22b   : > { %5198 = vtanh.f32 %v2521_v13  ;;  %v5155_v13 = vld [vmem:[#allocation10 + $0x90] sm:$0xff]  }
 0x22c   : > { %v2525_v19 = vadd.f32 %v2524_v28, %v2482_v16  ;;  %5200 = vtanh.f32 %v2523_v9  ;;  %v5156_v16 = vld [vmem:[#allocation10 + $0x48] sm:$0xff]   ;;  %4426 = vmatpush3.bf16.msra.mxu0 %v5155_v13 }
 0x22d   : > { %v5158_v9 = vld [vmem:[#allocation10 + $0xc8] sm:$0xff]   ;;  %4405 = vmatprep.subr.bf16.mxu1 %v5156_v16 }
 0x22e   : > { %5202 = vtanh.f32 %v2525_v19  ;;  %4427 = vmatprep.subr.bf16.mxu0 %v5158_v9  ;;  %v5162_v19 = vld [vmem:[#allocation10 + $0xc0] sm:$0xff]   ;;  %v5186_v13 = vld [vmem:[#allocation13 + $0x8] sm:$0xff]  }
 0x22f   : > { %v5187_v16 = vld [vmem:[#allocation13] sm:$0xff]  }
 0x263   : > { %v2561_v31 = vpop.f32.mrf.mxu0 }
 0x264   : > { %v2604_v8 = vpop.f32.mrf.mxu1  ;;  %v2562_v12 = vadd.f32 %v2561_v31, %v788_v59  ;;  %v5857_v31 = vpop.eup %5190 }
 0x265   : > { %v2563_v38 = vpop.f32.mrf.mxu0 }
 0x266   : > { %v2606_v33 = vpop.f32.mrf.mxu1  ;;  %v2564_v15 = vadd.f32 %v2563_v38, %v792_v4  ;;  %v2605_v11 = vadd.f32 %v2604_v8, %v2562_v12 }
 0x267   : > { %v2565_v43 = vpop.f32.mrf.mxu0 }
 0x268   : > { %v2608_v34 = vpop.f32.mrf.mxu1  ;;  %v2566_v22 = vadd.f32 %v2565_v43, %v788_v59  ;;  %v2607_v23 = vadd.f32 %v2606_v33, %v2564_v15  ;;  %v5861_v33 = vpop.eup %5192  ;;  %v5159_v15 = vld [vmem:[#allocation10 + $0x88] sm:$0xff]  }
 0x269   : > { %v2567_v55 = vpop.f32.mrf.mxu0  ;;  %v5863_v35 = vpop.eup %5194  ;;  %4428 = vmatpush3.bf16.msra.mxu0 %v5159_v15 }
 0x26a   : > { %v2610_v47 = vpop.f32.mrf.mxu1  ;;  %v2568_v21 = vadd.f32 %v2567_v55, %v792_v4  ;;  %v2609_v24 = vadd.f32 %v2608_v34, %v2566_v22  ;;  %v5869_v38 = vpop.eup %5196  ;;  %v5161_v22 = vld [vmem:[#allocation10] sm:$0xff]   ;;  %4429 = vmatprep.subr.bf16.mxu0 %v5162_v19 }
 0x26b   : > { %v5871_v34 = vpop.eup %5198 }
 0x26c   : > { %v2611_v14 = vadd.f32 %v2610_v47, %v2568_v21  ;;  %v5875_v42 = vpop.eup %5200 }
 0x26d   : > { %v5882_v48 = vpop.eup %5202 }
 0x284   : > { %v5843_v56 = vpop.f32.mrf.mxu1 }
 0x285   : > { %v3102_v36 = vmul.f32 %v5857_v31, %v5843_v56 }
 0x286   : > { %v5845_v10 = vpop.f32.mrf.mxu1 }
 0x287   : > { %v3103_v32 = vmul.f32 %v5853_v30, %v5845_v10 }
 0x288   : > { %v5847_v18 = vpop.f32.mrf.mxu1 }
 0x289   : > { %v3114_v40 = vadd.f32 %v3103_v32, %v3102_v36  ;;  %v3108_v43 = vmul.f32 %v5863_v35, %v5847_v18 }
 0x28a   : > { %v5849_v26 = vpop.f32.mrf.mxu1 }
 0x28b   : > { %v3109_v41 = vmul.f32 %v5869_v38, %v5849_v26 }
 0x28d   : > { %v3121_v49 = vadd.f32 %v3109_v41, %v3108_v43 }
 0x2a3   : > { %v2647_v63 = vpop.f32.mrf.mxu0 }
 0x2a4   : > { %v2648_v25 = vadd.f32 %v2647_v63, %v2605_v11  ;;  %v5851_v5 = vpop.f32.mrf.mxu1  ;;  %v5160_v11 = vld [vmem:[#allocation10 + $0x40] sm:$0xff]  }
 0x2a5   : > { %v2649_v17 = vpop.f32.mrf.mxu0  ;;  %v3104_v37 = vmul.f32 %v5861_v33, %v5851_v5 }
 0x2a6   : > { %v2650_v27 = vadd.f32 %v2649_v17, %v2607_v23  ;;  %5204 = vtanh.f32 %v2648_v25  ;;  %v5855_v28 = vpop.f32.mrf.mxu1  ;;  %v5157_v17 = vld [vmem:[#allocation10 + $0x8] sm:$0xff]   ;;  %v5164_v23 = vld [vmem:[#allocation10 + $0x178] sm:$0xff]  }
 0x2a7   : > { %v2651_v20 = vpop.f32.mrf.mxu0  ;;  %v3115_v46 = vadd.f32 %v3114_v40, %v3104_v37  ;;  %v3105_v44 = vmul.f32 %v5871_v34, %v5855_v28  ;;  %4406 = vmatpush3.bf16.msra.mxu1 %v5157_v17 }
 0x2a8   : > { %v2652_v51 = vadd.f32 %v2651_v20, %v2609_v24  ;;  %5206 = vtanh.f32 %v2650_v27  ;;  %v3054_v39 = vpop.f32.mrf.mxu1  ;;  %v5163_v20 = vld [vmem:[#allocation10 + $0x80] sm:$0xff]   ;;  %4407 = vmatprep.subr.bf16.mxu1 %v5160_v11 }
 0x2a9   : > { %v2653_v29 = vpop.f32.mrf.mxu0  ;;  %v3110_v45 = vmul.f32 %v5875_v42, %v3054_v39  ;;  %v3116_v53 = vadd.f32 %v3115_v46, %v3105_v44  ;;  %4430 = vmatpush3.bf16.msra.mxu0 %v5163_v20 }
 0x2aa   : > { %v2654_v8 = vadd.f32 %v2653_v29, %v2611_v14  ;;  %5208 = vtanh.f32 %v2652_v51  ;;  %v3056_v47 = vpop.f32.mrf.mxu1 }
 0x2ab   : > { %v3122_v54 = vadd.f32 %v3121_v49, %v3110_v45  ;;  %v3111_v55 = vmul.f32 %v5882_v48, %v3056_v47  ;;  %4408 = vmatpush3.bf16.msra.mxu1 %v5161_v22  ;;  %v5165_v45 = vld [vmem:[#allocation10 + $0x138] sm:$0xff]   ;;  %v5166_v49 = vld [vmem:[#allocation10 + $0x170] sm:$0xff]  }
 0x2ac   : > { %5210 = vtanh.f32 %v2654_v8  ;;  %4437 = vmatprep.subr.bf16.mxu1 %v5164_v23  ;;  %v4329_v23 = vld [vmem:[#allocation11] ss:$0 sm:$0xff] }
 0x2ad   : > { %v3123_v0 = vadd.f32 %v3122_v54, %v3111_v55  ;;  %v5173_v54 = vld [vmem:[#allocation10 + $0x118] sm:$0xff]   ;;  %v5174_v55 = vld [vmem:[#allocation10 + $0x150] sm:$0xff]  }
 0x2b3   : > { %v5884_v50 = vpop.eup %5204 }
 0x2b5   : > { %v5891_v58 = vpop.eup %5206 }
 0x2b7   : > { %v5894_v62 = vpop.eup %5208 }
 0x2b9   : > { %v5211_v4 = vpop.eup %5210 }
 0x2c3   : > { %v5886_v52 = vpop.f32.mrf.mxu0 }
 0x2c4   : > { %v3106_v57 = vmul.f32 %v5884_v50, %v5886_v52 }
 0x2c5   : > { %v3095_v59 = vpop.f32.mrf.mxu0 }
 0x2c6   : > { %v3107_v60 = vmul.f32 %v5891_v58, %v3095_v59  ;;  %v3117_v61 = vadd.f32 %v3116_v53, %v3106_v57  ;;  %v5172_v53 = vld [vmem:[#allocation10 + $0x158] sm:$0xff]   ;;  %v5175_v57 = vld [vmem:[#allocation10 + $0x110] sm:$0xff]  }
 0x2c7   : > { %v5896_v63 = vpop.f32.mrf.mxu0 }
 0x2c8   : > { %v3112_v1 = vmul.f32 %v5894_v62, %v5896_v63  ;;  %v3118_v2 = vadd.f32 %v3117_v61, %v3107_v60  ;;  %v5178_v61 = vld [vmem:[#allocation10 + $0x140] sm:$0xff]  }
 0x2c9   : > { %v3099_v6 = vpop.f32.mrf.mxu0 }
 0x2ca   : > { %v3113_v7 = vmul.f32 %v5211_v4, %v3099_v6  ;;  %3119 = vadd.xlane.f32.xlu1 %v3118_v2  ;;  %v3124_v3 = vadd.f32 %v3123_v0, %v3112_v1  ;;  %v5179_v1 = vld [vmem:[#allocation10 + $0x100] sm:$0xff]  }
 0x2cc   : > { %v3125_v12 = vadd.f32 %v3124_v3, %v3113_v7  ;;  %v5180_v7 = vld [vmem:[#allocation13 + $0x38] sm:$0xff]   ;;  %v5528_v3 = vmov 0.0  }
 0x2cd   : > { %4468 = vmatprep.subr.bf16.mxu0 %v5528_v3 }
 0x2ce   : > { %3126 = vadd.xlane.f32.xlu1 %v3125_v12  ;;  %v5182_v12 = vld [vmem:[#allocation13 + $0x28] sm:$0xff]  }
 0x353   : > { %v3120_v21 = vpop.xlane.xlu1 %3119 }
 0x354   : > { %v3129_v25 = vmul.f32 %v3120_v21, %v5845_v10  ;;  %v3128_v24 = vmul.f32 %v3120_v21, %v5843_v56  ;;  %v3130_v27 = vmul.f32 %v3120_v21, %v5851_v5  ;;  %v3131_v14 = vmul.f32 %v3120_v21, %v5855_v28 }
 0x355   : > { %v3133_v36 = vmul.f32 %v3120_v21, %v3095_v59  ;;  %v5177_v59 = vld [vmem:[#allocation10 + $0x108] sm:$0xff]   ;;  %v3132_v0 = vmul.f32 %v3120_v21, %v5886_v52 }
 0x356   : > { %v3141_v37 = vsub.f32 %v5853_v30, %v3129_v25  ;;  %v3140_v41 = vsub.f32 %v5857_v31, %v3128_v24  ;;  %v3142_v5 = vsub.f32 %v5861_v33, %v3130_v27  ;;  %v5167_v33 = vld [vmem:[#allocation10 + $0x130] sm:$0xff]   ;;  %v5183_v52 = vld [vmem:[#allocation13 + $0x20] sm:$0xff]  }
 0x357   : > { %v3127_v29 = vpop.xlane.xlu1 %3126  ;;  %v3145_v31 = vsub.f32 %v5891_v58, %v3133_v36  ;;  %v5176_v58 = vld [vmem:[#allocation10 + $0x148] sm:$0xff]  }
 0x358   : > { %v3134_v51 = vmul.f32 %v3127_v29, %v5847_v18  ;;  %v3136_v8 = vmul.f32 %v3127_v29, %v3054_v39  ;;  %v3135_v32 = vmul.f32 %v3127_v29, %v5849_v26  ;;  %v3137_v40 = vmul.f32 %v3127_v29, %v3056_v47 }
 0x359   : > { %v3139_v43 = vmul.f32 %v3127_v29, %v3099_v6  ;;  %v3143_v18 = vsub.f32 %v5871_v34, %v3131_v14  ;;  %v5169_v34 = vld [vmem:[#allocation10 + $0x128] sm:$0xff]   ;;  %v3138_v60 = vmul.f32 %v3127_v29, %v5896_v63  ;;  %v5181_v63 = vld [vmem:[#allocation13 + $0x30] sm:$0xff]  }
 0x35a   : > { %v3147_v10 = vsub.f32 %v5869_v38, %v3135_v32  ;;  %v3146_v56 = vsub.f32 %v5863_v35, %v3134_v51  ;;  %v3148_v28 = vsub.f32 %v5875_v42, %v3136_v8  ;;  %v3149_v39 = vsub.f32 %v5882_v48, %v3137_v40  ;;  %v5168_v38 = vld [vmem:[#allocation10 + $0x168] sm:$0xff]   ;;  %v5170_v42 = vld [vmem:[#allocation10 + $0x160] sm:$0xff]  }
 0x35b   : > { %v3151_v26 = vsub.f32 %v5211_v4, %v3139_v43  ;;  %v5171_v48 = vld [vmem:[#allocation10 + $0x120] sm:$0xff]   ;;  %v3150_v2 = vsub.f32 %v5894_v62, %v3138_v60  ;;  %v3144_v4 = vsub.f32 %v5884_v50, %v3132_v0  ;;  %v5185_v50 = vld [vmem:[#allocation13 + $0x10] sm:$0xff]  }
 0x35c   : > { %v3153_v46 = vpack.c.bf16 %v3147_v10, %v3141_v37  ;;  %v3152_v44 = vpack.c.bf16 %v3146_v56, %v3140_v41  ;;  %v3154_v30 = vpack.c.bf16 %v3148_v28, %v3142_v5  ;;  %v3155_v47 = vpack.c.bf16 %v3149_v39, %v3143_v18  ;;  %v5184_v62 = vld [vmem:[#allocation13 + $0x18] sm:$0xff]  }
 0x35d   : > { %v3157_v35 = vpack.c.bf16 %v3151_v26, %v3145_v31  ;;  %v3156_v6 = vpack.c.bf16 %v3150_v2, %v3144_v4  ;;  %v4378_v26 = vld [vmem:[#allocation14] ss:$0 sm:$0xff] }
 0x35e   : > { %3581 = vmatprep.mubr.bf16.mxu1 %v3153_v46  ;;  %3622 = vmatprep.mubr.bf16.mxu0 %v3155_v47 }
 0x35f   : > { %3582 = vmatmul.mubr.bf16.vlgmr.msra.gmra.mxu1 %v3152_v44  ;;  %3623 = vmatmul.mubr.bf16.vlgmr.msra.gmra.mxu0 %v3154_v30 }
 0x360   : > { %4438 = vmatpush3.bf16.msra.mxu1 %v5165_v45  ;;  %3663 = vmatprep.mubr.bf16.mxu1 %v3157_v35 }
 0x361   : > { %4439 = vmatprep.subr.bf16.mxu1 %v5166_v49  ;;  %4469 = vmatpush3.bf16.msra.mxu0 %v5180_v7 }
 0x362   : > { %4470 = vmatprep.subr.bf16.mxu0 %v5528_v3  ;;  %4484 = vmatprep.mubr.msk.bf16.mxu0 %vm5529_vm3, %v5528_v3 }
 0x364   : > { %4440 = vmatpush3.bf16.msra.mxu1 %v5167_v33 }
 0x365   : > { %4441 = vmatprep.subr.bf16.mxu1 %v5168_v38  ;;  %4471 = vmatpush3.bf16.msra.mxu0 %v5181_v63 }
 0x366   : > { %4472 = vmatprep.subr.bf16.mxu0 %v5528_v3 }
 0x368   : > { %4442 = vmatpush3.bf16.msra.mxu1 %v5169_v34 }
 0x369   : > { %4443 = vmatprep.subr.bf16.mxu1 %v5170_v42  ;;  %4473 = vmatpush3.bf16.msra.mxu0 %v5182_v12 }
 0x36a   : > { %4474 = vmatprep.subr.bf16.mxu0 %v5528_v3 }
 0x36c   : > { %4444 = vmatpush3.bf16.msra.mxu1 %v5171_v48 }
 0x36d   : > { %4445 = vmatprep.subr.bf16.mxu1 %v5172_v53  ;;  %4475 = vmatpush3.bf16.msra.mxu0 %v5183_v52 }
 0x36e   : > { %4476 = vmatprep.subr.bf16.mxu0 %v5528_v3 }
 0x370   : > { %4446 = vmatpush3.bf16.msra.mxu1 %v5173_v54 }
 0x371   : > { %4447 = vmatprep.subr.bf16.mxu1 %v5174_v55  ;;  %4477 = vmatpush3.bf16.msra.mxu0 %v5184_v62 }
 0x372   : > { %4478 = vmatprep.subr.bf16.mxu0 %v5528_v3 }
 0x374   : > { %4448 = vmatpush3.bf16.msra.mxu1 %v5175_v57 }
 0x375   : > { %4449 = vmatprep.subr.bf16.mxu1 %v5176_v58  ;;  %4479 = vmatpush3.bf16.msra.mxu0 %v5185_v50 }
 0x376   : > { %4480 = vmatprep.subr.bf16.mxu0 %v5528_v3 }
 0x378   : > { %4450 = vmatpush3.bf16.msra.mxu1 %v5177_v59 }
 0x379   : > { %4451 = vmatprep.subr.bf16.mxu1 %v5178_v61  ;;  %4481 = vmatpush3.bf16.msra.mxu0 %v5186_v13 }
 0x37a   : > { %4482 = vmatprep.subr.bf16.mxu0 %v5528_v3 }
 0x37c   : > { %4452 = vmatpush3.bf16.msra.mxu1 %v5179_v1 }
 0x37d   : > { %4483 = vmatpush3.bf16.msra.mxu0 %v5187_v16 }
 0x37f   : > { %3664 = vmatmul.mubr.bf16.vlgmr.msra.gmra.mxu1 %v3156_v6 }
 0x41f   : > { %v4409_v17 = vpop.f32.mrf.mxu1  ;;  %v4431_v15 = vpop.f32.mrf.mxu0 }
 0x421   : > { %v4410_v9 = vpop.f32.mrf.mxu1  ;;  %v4432_v22 = vpop.f32.mrf.mxu0 }
 0x422   : > { %v4411_v19 = vadd.f32 %v4410_v9, %v4409_v17  ;;  %v4433_v29 = vadd.f32 %v4432_v22, %v4431_v15 }
 0x423   : > { %v4412_v11 = vpop.f32.mrf.mxu1  ;;  %v4434_v21 = vpop.f32.mrf.mxu0 }
 0x424   : > { %v3584_v24 = vadd.f32 %v4411_v19, %v4329_v23 }
 0x425   : > { %v4413_v20 = vpop.f32.mrf.mxu1  ;;  %v4435_v14 = vpop.f32.mrf.mxu0 }
 0x426   : > { %v4414_v25 = vadd.f32 %v4413_v20, %v4412_v11  ;;  %v3625_v36 = vadd.f32 %v4433_v29, %v3584_v24  ;;  %v4436_v40 = vadd.f32 %v4435_v14, %v4434_v21 }
 0x428   : > { %v3587_v8 = vadd.f32 %v4414_v25, %v4329_v23 }
 0x42a   : > { %v3628_v10 = vadd.f32 %v4436_v40, %v3587_v8 }
 0x43f   : > { %v4453_v27 = vpop.f32.mrf.mxu1 }
 0x441   : > { %v4454_v51 = vpop.f32.mrf.mxu1 }
 0x442   : > { %v4455_v32 = vadd.f32 %v4454_v51, %v4453_v27 }
 0x443   : > { %v4456_v37 = vpop.f32.mrf.mxu1 }
 0x444   : > { %v3666_v41 = vadd.f32 %v4455_v32, %v3625_v36 }
 0x445   : > { %v4457_v43 = vpop.f32.mrf.mxu1 }
 0x446   : > { %v4458_v56 = vadd.f32 %v4457_v43, %v4456_v37  ;;  %5212 = vtanh.f32 %v3666_v41 }
 0x448   : > { %v3669_v5 = vadd.f32 %v4458_v56, %v3628_v10 }
 0x44a   : > { %5214 = vtanh.f32 %v3669_v5 }
 0x453   : > { %v5213_v28 = vpop.eup %5212 }
 0x457   : > { %v5215_v18 = vpop.eup %5214 }
 0x458   : > { %v3674_v39 = vpack.c.bf16 %v5215_v18, %v5213_v28 }
 0x45a   : > { %4485 = vmatmul.mubr.bf16.vlgmr.msra.gmra.mxu0 %v3674_v39 }
 0x51a   : > { %v3780_v46 = vpop.f32.mrf.mxu0 }
 0x51b   : > { %v3781_v44 = vadd.f32 %v4378_v26, %v3780_v46 }
 0x51c   : > { %v4486_v30 = vpop.f32.mrf.mxu0 }
 0x51d   : > { %3787 = vst [vmem:[%s463_s28] sm:$0xff] %v3781_v44 }
 0x51e   : > { %v3783_v45 = vpop.f32.mrf.mxu0 }
 0x51f   : > { %v3784_v47 = vadd.f32 %v4378_v26, %v3783_v45 }
 0x520   : > { %v4487_v31 = vpop.f32.mrf.mxu0 }
 0x521   : > { %3788 = vst [vmem:[%s463_s28 + $0x8] sm:$0xff] %v3784_v47 }
 0x522   : > { %5445 = shalt.err (!%p5442_p10)
}
 0x523   : > { %s5446_s25 = scalar_lea.hbm %s5926_s29, 256  ;;  %s5450_s20 = scalar_lea.hbm %s5978_s9, 512 }
 0x524   : > { %p5447_p4 = scmp.ne.s32.totalorder %s5926_s29, %s5446_s25  ;;  %p5451_p12 = scmp.lt.s32.totalorder %s5926_s29, %s5978_s9 }
 0x525   : > { %p5452_p0 = scmp.lt.s32.totalorder %s5450_s20, %s5446_s25 }
 0x526   : > { %p5448_p9 = pnand %p5447_p4, %p6013_p1 }
 0x527   : > { %p5453_p2 = por %p5452_p0, %p5451_p12 }
 0x528   : > { %p5449_p11 = pneg %p5448_p9 }
 0x52a   : > { %p5454_p5 = pnand %p5453_p2, %p5449_p11 }
 0x52c   : > { %5457 = shalt.err (!%p5454_p5)
}
 0x52d   : > { %s5531_s2 = smov 128   ;;  %s5532_s4 = smov 8  }
 0x52e   : > { %4521 = dma.vmem_to_hbm [thread:$0]  (%p6013_p1), %s5921_s22, 256, %s5926_s29, %s3790_s17, %s5531_s2, %s5531_s2, %s5532_s4  }
 0x52f PF: > { %s3818_s14 = sand.u32 1, %s5500_s30   ;;  %p6014_p7 = scmp.ne.s32.totalorder %s5997_s23, 0 }
 0x530   : > { %p6015_p8 = scmp.ge.s32.totalorder %s5512_s12, 2  ;;  %s3819_s15 = scalar_lea.sflag [#allocation4], %s3818_s14 }
 0x532   : > { %p4550_p3 = pnand %p6015_p8, %p6014_p7 }
 0x534   : > { %p4551_p13 = pneg %p4550_p3 }
 0x536   : > { %5495 = dma.done.wait (%p4551_p13), %s3819_s15, 256  }
 0x537   : > { %5497 = vsyncadd (%p4551_p13), %s3819_s15, 4294967040  ;;  %p26_p6 = scmp.ge.s32.totalorder %s5693_s19, 4   ;;  %s6016_s30 = smov %s5504_s10 }
 0x538   : > { %s6017_s10 = smov %s5508_s11  ;;  %s6018_s11 = smov %s5705_s27 }
 0x539   : > { %s6019_s12 = smov %s5693_s19  ;;  %28 = sbr.rel (!%p26_p6) target bundleno = 13 (0xd), region = 132 }
 0x53e   :  { %3824 = vsyncpa [#allocation3], 1 }
 0x53f   :  { %3826 = vsyncpa [#allocation3 + $0x1], 1 }
 0x540   :  { %3827 = vsyncpa [#allocation6], 1 }
 0x541   :  { %3828 = vsyncpa [#allocation9], 1 }
 0x542   :  { %3829 = vsyncpa [#allocation12], 1 }
 0x543   :  { %3830 = vsyncpa [#allocation15], 1 }
 0x544   :  { %3831 = vsyncpa [#allocation4], 1 }
 0x545   :  { %3833 = vsyncpa [#allocation4 + $0x1], 1 }

</bundles_post_ra>
